<compile_context>
chip_gen: v7x
topology: tpu7x:2x2x1
jax: 0.10.0
libtpu: 0.0.40
codegen_flags: <defaults>
</compile_context>

<pallas_src>
import functools
import math

import jax
import jax.numpy as jnp
from jax import lax
from jax.experimental import pallas as pl
from jax.experimental.pallas import tpu as pltpu


_MATMUL_DTYPE = jnp.bfloat16   # MXU input dtype; accumulation is always f32.


def _mm(a, w):
    """MXU matmul: bf16 inputs, f32 accumulation."""
    return jnp.dot(a.astype(_MATMUL_DTYPE), w.astype(_MATMUL_DTYPE),
                   preferred_element_type=jnp.float32)


def _layer_norm(x, gamma, beta, eps):
    # PyTorch nn.LayerNorm: biased variance over the last dim, f32 math.
    mean = jnp.mean(x, axis=-1, keepdims=True)
    var = jnp.mean((x - mean) ** 2, axis=-1, keepdims=True)
    return (x - mean) * lax.rsqrt(var + eps) * gamma + beta


# --------------------------------------------------------------------------- #
# Pass 1: fused QKV projection -> heads-major bf16 caches (B, heads, S, dh).
# The 1/sqrt(dh) softmax scale is folded into the Q weight in the wrapper.
# --------------------------------------------------------------------------- #
def qkv_proj_kernel(x_ref, w_ref, b_ref, q_ref, k_ref, v_ref,
                    *, num_heads, head_dim):
    H = x_ref.shape[-1]
    x = x_ref[...]                                     # (Ts, H) f32
    qkv = _mm(x, w_ref[...]) + b_ref[...]              # (Ts, 3H) f32 accumulate
    for h in range(num_heads):                         # static unroll over heads
        lo = h * head_dim
        q_ref[h] = qkv[:, lo:lo + head_dim].astype(q_ref.dtype)
        k_ref[h] = qkv[:, H + lo:H + lo + head_dim].astype(k_ref.dtype)
        v_ref[h] = qkv[:, 2 * H + lo:2 * H + lo + head_dim].astype(v_ref.dtype)


# --------------------------------------------------------------------------- #
# Pass 2: per (batch, q_tile): attention over full-S heads-major K/V + output
# projection + residual/LN1 + chunked FFN (GELU) + residual/LN2.
# --------------------------------------------------------------------------- #
def encoder_block_kernel(
    x_ref, mask_ref, q_ref, k_ref, v_ref,
    wo_ref, bo_ref, g1_ref, be1_ref,
    w1_ref, b1_ref, w2_ref, b2_ref, g2_ref, be2_ref,
    o_ref, ctx_ref,
    *, num_heads, head_dim, eps, ffn_chunk,
):
    x = x_ref[...]                                     # (Tq, H) f32
    mask_b = mask_ref[...]                             # (1, S) additive bias (f32)
    trans_b = (((1,), (1,)), ((), ()))                 # contract on last dim of both

    # ---- multi-head attention: heads are leading-dim ref indices ------------
    for h in range(num_heads):                         # static unroll; per-head
        # Q is pre-scaled by 1/sqrt(dh) in pass 1, so no per-score multiply here.
        s = lax.dot_general(q_ref[h], k_ref[h], trans_b,
                            preferred_element_type=jnp.float32)   # (Tq, S)
        s = s + mask_b
        m = jnp.max(s, axis=-1, keepdims=True)
        e = jnp.exp(s - m)
        denom = jnp.sum(e, axis=-1, keepdims=True)
        p = e * pl.reciprocal(denom, approx=True)      # EUP reciprocal
        ch = jnp.dot(p.astype(_MATMUL_DTYPE), v_ref[h],
                     preferred_element_type=jnp.float32)           # (Tq, dh)
        ctx_ref[:, h * head_dim:(h + 1) * head_dim] = ch

    attn_out = _mm(ctx_ref[...], wo_ref[...]) + bo_ref[...]        # (Tq, H)

    # ---- residual + LayerNorm 1 (f32) ----------------------------------------
    h1 = _layer_norm(x + attn_out, g1_ref[...], be1_ref[...], eps)
    h1_b = h1.astype(_MATMUL_DTYPE)

    # ---- FFN, chunked over the intermediate dimension -------------------------
    I = w1_ref.shape[-1]
    n_chunks = I // ffn_chunk
    ffn = jnp.zeros_like(h1)
    for c in range(n_chunks):                          # static unroll over I chunks
        c0 = c * ffn_chunk
        inter = (jnp.dot(h1_b, w1_ref[:, c0:c0 + ffn_chunk],
                         preferred_element_type=jnp.float32)
                 + b1_ref[:, c0:c0 + ffn_chunk])
        inter = jax.nn.gelu(inter, approximate=False)  # nn.GELU default = exact erf
        ffn = ffn + jnp.dot(inter.astype(_MATMUL_DTYPE),
                            w2_ref[c0:c0 + ffn_chunk, :],
                            preferred_element_type=jnp.float32)
    ffn = ffn + b2_ref[...]

    # ---- residual + LayerNorm 2 (f32) ----------------------------------------
    out = _layer_norm(h1 + ffn, g2_ref[...], be2_ref[...], eps)
    o_ref[...] = out.astype(o_ref.dtype)


# --------------------------------------------------------------------------- #
# Wrapper helpers
# --------------------------------------------------------------------------- #
def _pick_seq_tile(S, target):
    for t in (target, 256, 128, 64, 32, 16, 8):
        if t <= S and S % t == 0:
            return t
    return S


def _pick_ffn_chunk(I):
    if I <= 1024:
        return I
    for c in (1024, 512, 256, 128):
        if I % c == 0:
            return c
    return I


def _vmem_cap_bytes():
    try:
        cap = int(pltpu.get_tpu_info().vmem_capacity_bytes)
        if cap > 0:
            return cap
    except Exception:
        pass
    return 128 * 1024 * 1024   # v5e/v6e default if query unavailable


def _vmem_limit_bytes(S, H, I, Tq, C, cap):
    bf16, f32 = 2, 4
    # Constants (weights/biases/LN) are single-buffered (pl.Buffered(1)).
    weights = (H * H + 2 * H * I) * bf16 + (2 * I + 12 * H) * f32
    resident = 2 * S * H * bf16 + S * f32              # K, V caches + mask, single-buffered
    dbuf = 2 * (2 * Tq * H * f32 + Tq * H * bf16)      # x/out tiles (f32) + q tile (bf16), double-buffered
    temps = (3 * Tq * S * f32                          # per-head score / exp tiles
             + Tq * C * (f32 + bf16)                   # FFN chunk intermediate (+bf16 copy)
             + 8 * Tq * H * f32)                       # ctx scratch + LN/residual temporaries
    est = int((weights + resident + dbuf + temps) * 1.25) + (4 << 20)
    return max(min(est, int(cap * 0.85)), 16 << 20)


# --------------------------------------------------------------------------- #
# Wrapper
# --------------------------------------------------------------------------- #
def transformer_encoder_layer(hidden_states, attention_mask, params,
                              *, num_heads, eps):
    """hidden_states: (B, S, H) float32; attention_mask: (B, S) (1 = keep)."""
    B, S, H = hidden_states.shape
    assert H % num_heads == 0
    head_dim = H // num_heads

    (wq, bq, wk, bk, wv, bv, wo, bo,
     g1, be1, w1, b1, w2, b2, g2, be2) = params
    I = w1.shape[1]

    if attention_mask is None:
        attention_mask = jnp.ones((B, S), jnp.float32)

    # Fold the 1/sqrt(dh) softmax scale into the Q projection, fuse Q|K|V weights.
    inv_scale = jnp.float32(1.0 / math.sqrt(head_dim))
    wqkv = jnp.concatenate([wq * inv_scale, wk, wv], axis=1).astype(_MATMUL_DTYPE)
    bqkv = jnp.concatenate([bq * inv_scale, bk, bv]).reshape(1, 3 * H).astype(jnp.float32)

    wo_b = wo.astype(_MATMUL_DTYPE)
    w1_b = w1.astype(_MATMUL_DTYPE)
    w2_b = w2.astype(_MATMUL_DTYPE)

    row = lambda v: v.reshape(1, -1).astype(jnp.float32)
    bo2, g12, be12, b12, b22, g22, be22 = map(row, (bo, g1, be1, b1, b2, g2, be2))

    # Additive mask bias (B, 1, S): (1 - mask) * -10000 (matches PyTorch).
    mask_bias = ((1.0 - attention_mask.astype(jnp.float32)) * -10000.0).reshape(B, 1, S)

    cap = _vmem_cap_bytes()
    tile_target = 256 if cap >= (96 << 20) else 128    # 128-row q tiles on v7x (64 MiB VMEM)
    Tq = _pick_seq_tile(S, tile_target)
    Tkv = _pick_seq_tile(S, tile_target)
    C = _pick_ffn_chunk(I)
    vmem_limit = _vmem_limit_bytes(S, H, I, Tq, C, cap)

    def run(use_buffered):
        def const_spec(shape, index_map):
            if use_buffered:
                return pl.BlockSpec(shape, index_map, pipeline_mode=pl.Buffered(1))
            return pl.BlockSpec(shape, index_map)

        const2 = lambda arr: const_spec(arr.shape, lambda b, i: (0, 0))

        # ---- pass 1: fused QKV projection -> heads-major bf16 caches ---------
        qkv_kernel = functools.partial(qkv_proj_kernel,
                                       num_heads=num_heads, head_dim=head_dim)
        hm_shape = jax.ShapeDtypeStruct((B, num_heads, S, head_dim), _MATMUL_DTYPE)
        hm_block = pl.BlockSpec((pl.Squeezed(), num_heads, Tkv, head_dim),
                                lambda b, i: (b, 0, i, 0))
        q_cache, k_cache, v_cache = pl.pallas_call(
            qkv_kernel,
            out_shape=(hm_shape, hm_shape, hm_shape),
            grid_spec=pltpu.PrefetchScalarGridSpec(
                num_scalar_prefetch=0,
                grid=(B, S // Tkv),
                in_specs=[
                    pl.BlockSpec((pl.Squeezed(), Tkv, H), lambda b, i: (b, i, 0)),
                    const2(wqkv), const2(bqkv),
                ],
                out_specs=(hm_block, hm_block, hm_block),
            ),
            compiler_params=pltpu.CompilerParams(
                dimension_semantics=("parallel", "parallel"),
                vmem_limit_bytes=vmem_limit),
        )(hidden_states, wqkv, bqkv)

        # ---- pass 2: attention + output proj + LN1 + chunked FFN + LN2 -------
        enc_kernel = functools.partial(
            encoder_block_kernel,
            num_heads=num_heads, head_dim=head_dim, eps=eps, ffn_chunk=C)

        kv_spec = const_spec((pl.Squeezed(), num_heads, S, head_dim),
                             lambda b, i: (b, 0, 0, 0))
        return pl.pallas_call(
            enc_kernel,
            out_shape=jax.ShapeDtypeStruct((B, S, H), jnp.float32),
            grid_spec=pltpu.PrefetchScalarGridSpec(
                num_scalar_prefetch=0,
                grid=(B, S // Tq),
                in_specs=[
                    pl.BlockSpec((pl.Squeezed(), Tq, H), lambda b, i: (b, i, 0)),   # x tile
                    const_spec((pl.Squeezed(), 1, S), lambda b, i: (b, 0, 0)),      # mask bias
                    pl.BlockSpec((pl.Squeezed(), num_heads, Tq, head_dim),
                                 lambda b, i: (b, 0, i, 0)),                        # Q tile
                    kv_spec, kv_spec,                                               # K, V (full S)
                    const2(wo_b), const2(bo2), const2(g12), const2(be12),
                    const2(w1_b), const2(b12), const2(w2_b), const2(b22),
                    const2(g22), const2(be22),
                ],
                out_specs=pl.BlockSpec((pl.Squeezed(), Tq, H), lambda b, i: (b, i, 0)),
                scratch_shapes=[pltpu.VMEM((Tq, H), jnp.float32)],                  # ctx buffer
            ),
            compiler_params=pltpu.CompilerParams(
                dimension_semantics=("parallel", "parallel"),
                vmem_limit_bytes=vmem_limit),
        )(hidden_states, mask_bias, q_cache, k_cache, v_cache,
          wo_b, bo2, g12, be12, w1_b, b12, w2_b, b22, g22, be22)

    try:
        return run(True)
    except Exception:
        # TODO(synk): pipeline_mode=pl.Buffered(1) rejected by this JAX build;
        # falling back to default double-buffering (identical results).
        return run(False)


# --------------------------------------------------------------------------- #
# Pure-JAX reference (mirrors PyTorch module; dropout = identity).
# matmul_dtype=bf16 + fold_scale_into_q=True mirrors the kernel's MXU precision.
# --------------------------------------------------------------------------- #
def reference_jax(hidden_states, attention_mask, params, *, num_heads, eps,
                  matmul_dtype=jnp.float32, fold_scale_into_q=False):
    (wq, bq, wk, bk, wv, bv, wo, bo,
     g1, be1, w1, b1, w2, b2, g2, be2) = params
    B, S, H = hidden_states.shape
    dh = H // num_heads
    x = hidden_states.astype(jnp.float32)
    md = matmul_dtype
    inv = jnp.float32(1.0 / math.sqrt(dh))

    def mm(a, w):
        return jnp.dot(a.astype(md), w.astype(md),
                       preferred_element_type=jnp.float32)

    if fold_scale_into_q:
        q = mm(x, wq * inv) + bq * inv
        post = jnp.float32(1.0)
    else:
        q = mm(x, wq) + bq
        post = inv
    k = mm(x, wk) + bk
    v = mm(x, wv) + bv

    def split(t):
        return t.reshape(B, S, num_heads, dh).transpose(0, 2, 1, 3)

    q, k, v = split(q), split(k), split(v)
    scores = jnp.einsum("bhqd,bhkd->bhqk", q.astype(md), k.astype(md),
                        preferred_element_type=jnp.float32) * post
    mask = (1.0 - attention_mask.astype(jnp.float32))[:, None, None, :] * -10000.0
    scores = scores + mask
    probs = jax.nn.softmax(scores, axis=-1)
    ctx = jnp.einsum("bhqk,bhkd->bhqd", probs.astype(md), v.astype(md),
                     preferred_element_type=jnp.float32)
    ctx = ctx.transpose(0, 2, 1, 3).reshape(B, S, H)
    attn_out = mm(ctx, wo) + bo

    def ln(a, g, b_):
        mu = a.mean(-1, keepdims=True)
        var = ((a - mu) ** 2).mean(-1, keepdims=True)
        return (a - mu) * lax.rsqrt(var + eps) * g + b_

    h1 = ln(x + attn_out, g1, be1)
    inter = jax.nn.gelu(mm(h1, w1) + b1, approximate=False)
    ffn = mm(inter, w2) + b2
    return ln(h1 + ffn, g2, be2)


def init_params(key, hidden_size, intermediate_size):
    ks = jax.random.split(key, 12)
    H, I = hidden_size, intermediate_size
    s = 0.02

    def w(k, shape):
        return jax.random.normal(k, shape, jnp.float32) * s

    wq, wk, wv, wo = (w(ks[0], (H, H)), w(ks[1], (H, H)),
                      w(ks[2], (H, H)), w(ks[3], (H, H)))
    bq, bk, bv, bo = (w(ks[4], (H,)), w(ks[5], (H,)),
                      w(ks[6], (H,)), w(ks[7], (H,)))
    w1, b1 = w(ks[8], (H, I)), w(ks[9], (I,))
    w2, b2 = w(ks[10], (I, H)), w(ks[11], (H,))
    g1, be1 = jnp.ones((H,), jnp.float32), jnp.zeros((H,), jnp.float32)
    g2, be2 = jnp.ones((H,), jnp.float32), jnp.zeros((H,), jnp.float32)
    return (wq, bq, wk, bk, wv, bv, wo, bo,
            g1, be1, w1, b1, w2, b2, g2, be2)


if __name__ == "__main__":
    B, S, H = 2, 8, 32
    NUM_HEADS = 4
    INTERMEDIATE = 64
    EPS = 1e-12

    key = jax.random.PRNGKey(0)
    kx, km, kp = jax.random.split(key, 3)

    hidden_states = jax.random.normal(kx, (B, S, H), jnp.float32)
    # mask: 1 = attend, 0 = masked (mask out the last 2 positions of batch 1)
    attention_mask = jnp.ones((B, S), jnp.float32).at[1, -2:].set(0.0)

    params = init_params(kp, H, INTERMEDIATE)

    out = transformer_encoder_layer(
        hidden_states, attention_mask, params, num_heads=NUM_HEADS, eps=EPS)
    out = jax.block_until_ready(out)
    assert out.shape == (B, S, H)

    # Tight check against a reference using the same bf16 MXU inputs / f32 accum
    # (scale folded into Q exactly as the kernel does).
    ref_bf16 = reference_jax(hidden_states, attention_mask, params,
                             num_heads=NUM_HEADS, eps=EPS,
                             matmul_dtype=jnp.bfloat16, fold_scale_into_q=True)
    assert jnp.allclose(out, ref_bf16, atol=5e-3, rtol=5e-3), \
        "mismatch vs bf16-matmul reference"

    # Sanity check against the full-f32 reference (bf16 quantization tolerance).
    ref_f32 = reference_jax(hidden_states, attention_mask, params,
                            num_heads=NUM_HEADS, eps=EPS,
                            matmul_dtype=jnp.float32)
    assert jnp.allclose(out, ref_f32, atol=5e-2, rtol=5e-2), \
        "mismatch vs f32 reference"

    print("KERNEL_OK")
</pallas_src>

<mosaic_0001>
module attributes {stable_mosaic.version = 11 : i64} {
  func.func @qkv_proj_kernel(%arg0: i32, %arg1: i32, %arg2: memref<1x8x32xf32, #tpu.memory_space<vmem>>, %arg3: memref<32x96xbf16, #tpu.memory_space<vmem>>, %arg4: memref<1x96xf32, #tpu.memory_space<vmem>>, %arg5: memref<1x4x8x8xbf16, #tpu.memory_space<vmem>>, %arg6: memref<1x4x8x8xbf16, #tpu.memory_space<vmem>>, %arg7: memref<1x4x8x8xbf16, #tpu.memory_space<vmem>>) attributes {dimension_semantics = [#tpu.dimension_semantics<parallel>, #tpu.dimension_semantics<parallel>], iteration_bounds = array<i64: 2, 1>, scalar_prefetch = 0 : i64, scratch_operands = 0 : i64, tpu.core_type = #tpu.core_type<tc>, window_params = [{transform_indices = @transform_0, window_bounds = array<i64: 1, 8, 32>}, {pipeline_mode = #tpu.pipeline_mode<synchronous>, transform_indices = @transform_1, window_bounds = array<i64: 32, 96>}, {pipeline_mode = #tpu.pipeline_mode<synchronous>, transform_indices = @transform_2, window_bounds = array<i64: 1, 96>}, {transform_indices = @transform_3, window_bounds = array<i64: 1, 4, 8, 8>}, {transform_indices = @transform_4, window_bounds = array<i64: 1, 4, 8, 8>}, {transform_indices = @transform_5, window_bounds = array<i64: 1, 4, 8, 8>}]} {
    %c0 = arith.constant 0 : index
    %c0_0 = arith.constant 0 : index
    %c0_1 = arith.constant 0 : index
    %0 = vector.load %arg2[%c0, %c0_0, %c0_1] : memref<1x8x32xf32, #tpu.memory_space<vmem>>, vector<1x8x32xf32>
    %1 = vector.shape_cast %0 : vector<1x8x32xf32> to vector<8x32xf32>
    %c0_2 = arith.constant 0 : index
    %c0_3 = arith.constant 0 : index
    %2 = vector.load %arg3[%c0_2, %c0_3] : memref<32x96xbf16, #tpu.memory_space<vmem>>, vector<32x96xbf16>
    %3 = arith.truncf %1 : vector<8x32xf32> to vector<8x32xbf16>
    %cst = arith.constant dense<0.000000e+00> : vector<8x96xf32>
    %4 = tpu.matmul %3, %2, %cst {dimension_numbers = #tpu.dot_dimension_numbers<[1], [0], [0], [1], [0, 0, 1, 1], [], []>} : vector<8x32xbf16>, vector<32x96xbf16>, vector<8x96xf32> -> vector<8x96xf32>
    %c0_4 = arith.constant 0 : index
    %c0_5 = arith.constant 0 : index
    %5 = vector.load %arg4[%c0_4, %c0_5] : memref<1x96xf32, #tpu.memory_space<vmem>>, vector<1x96xf32>
    %6 = vector.broadcast %5 : vector<1x96xf32> to vector<8x96xf32>
    %7 = arith.addf %4, %6 : vector<8x96xf32>
    %8 = vector.extract_strided_slice %7 {offsets = [0, 0], sizes = [8, 8], strides = [1, 1]} : vector<8x96xf32> to vector<8x8xf32>
    %9 = arith.truncf %8 : vector<8x8xf32> to vector<8x8xbf16>
    %c0_6 = arith.constant 0 : index
    %c0_7 = arith.constant 0 : index
    %c0_8 = arith.constant 0 : index
    %c0_9 = arith.constant 0 : index
    %10 = vector.load %arg5[%c0_6, %c0_7, %c0_8, %c0_9] : memref<1x4x8x8xbf16, #tpu.memory_space<vmem>>, vector<1x1x8x8xbf16>
    %11 = vector.shape_cast %10 : vector<1x1x8x8xbf16> to vector<8x8xbf16>
    %12 = vector.shape_cast %9 : vector<8x8xbf16> to vector<1x1x8x8xbf16>
    tpu.vector_store %arg5[%c0_6, %c0_7, %c0_8, %c0_9], %12 {strides = array<i32>} : memref<1x4x8x8xbf16, #tpu.memory_space<vmem>>, vector<1x1x8x8xbf16>,
    %13 = vector.extract_strided_slice %7 {offsets = [0, 32], sizes = [8, 8], strides = [1, 1]} : vector<8x96xf32> to vector<8x8xf32>
    %14 = arith.truncf %13 : vector<8x8xf32> to vector<8x8xbf16>
    %c0_10 = arith.constant 0 : index
    %c0_11 = arith.constant 0 : index
    %c0_12 = arith.constant 0 : index
    %c0_13 = arith.constant 0 : index
    %15 = vector.load %arg6[%c0_10, %c0_11, %c0_12, %c0_13] : memref<1x4x8x8xbf16, #tpu.memory_space<vmem>>, vector<1x1x8x8xbf16>
    %16 = vector.shape_cast %15 : vector<1x1x8x8xbf16> to vector<8x8xbf16>
    %17 = vector.shape_cast %14 : vector<8x8xbf16> to vector<1x1x8x8xbf16>
    tpu.vector_store %arg6[%c0_10, %c0_11, %c0_12, %c0_13], %17 {strides = array<i32>} : memref<1x4x8x8xbf16, #tpu.memory_space<vmem>>, vector<1x1x8x8xbf16>,
    %18 = vector.extract_strided_slice %7 {offsets = [0, 64], sizes = [8, 8], strides = [1, 1]} : vector<8x96xf32> to vector<8x8xf32>
    %19 = arith.truncf %18 : vector<8x8xf32> to vector<8x8xbf16>
    %c0_14 = arith.constant 0 : index
    %c0_15 = arith.constant 0 : index
    %c0_16 = arith.constant 0 : index
    %c0_17 = arith.constant 0 : index
    %20 = vector.load %arg7[%c0_14, %c0_15, %c0_16, %c0_17] : memref<1x4x8x8xbf16, #tpu.memory_space<vmem>>, vector<1x1x8x8xbf16>
    %21 = vector.shape_cast %20 : vector<1x1x8x8xbf16> to vector<8x8xbf16>
    %22 = vector.shape_cast %19 : vector<8x8xbf16> to vector<1x1x8x8xbf16>
    tpu.vector_store %arg7[%c0_14, %c0_15, %c0_16, %c0_17], %22 {strides = array<i32>} : memref<1x4x8x8xbf16, #tpu.memory_space<vmem>>, vector<1x1x8x8xbf16>,
    %23 = vector.extract_strided_slice %7 {offsets = [0, 8], sizes = [8, 8], strides = [1, 1]} : vector<8x96xf32> to vector<8x8xf32>
    %24 = arith.truncf %23 : vector<8x8xf32> to vector<8x8xbf16>
    %c0_18 = arith.constant 0 : index
    %c1 = arith.constant 1 : index
    %c0_19 = arith.constant 0 : index
    %c0_20 = arith.constant 0 : index
    %25 = vector.load %arg5[%c0_18, %c1, %c0_19, %c0_20] : memref<1x4x8x8xbf16, #tpu.memory_space<vmem>>, vector<1x1x8x8xbf16>
    %26 = vector.shape_cast %25 : vector<1x1x8x8xbf16> to vector<8x8xbf16>
    %27 = vector.shape_cast %24 : vector<8x8xbf16> to vector<1x1x8x8xbf16>
    tpu.vector_store %arg5[%c0_18, %c1, %c0_19, %c0_20], %27 {strides = array<i32>} : memref<1x4x8x8xbf16, #tpu.memory_space<vmem>>, vector<1x1x8x8xbf16>,
    %28 = vector.extract_strided_slice %7 {offsets = [0, 40], sizes = [8, 8], strides = [1, 1]} : vector<8x96xf32> to vector<8x8xf32>
    %29 = arith.truncf %28 : vector<8x8xf32> to vector<8x8xbf16>
    %c0_21 = arith.constant 0 : index
    %c1_22 = arith.constant 1 : index
    %c0_23 = arith.constant 0 : index
    %c0_24 = arith.constant 0 : index
    %30 = vector.load %arg6[%c0_21, %c1_22, %c0_23, %c0_24] : memref<1x4x8x8xbf16, #tpu.memory_space<vmem>>, vector<1x1x8x8xbf16>
    %31 = vector.shape_cast %30 : vector<1x1x8x8xbf16> to vector<8x8xbf16>
    %32 = vector.shape_cast %29 : vector<8x8xbf16> to vector<1x1x8x8xbf16>
    tpu.vector_store %arg6[%c0_21, %c1_22, %c0_23, %c0_24], %32 {strides = array<i32>} : memref<1x4x8x8xbf16, #tpu.memory_space<vmem>>, vector<1x1x8x8xbf16>,
    %33 = vector.extract_strided_slice %7 {offsets = [0, 72], sizes = [8, 8], strides = [1, 1]} : vector<8x96xf32> to vector<8x8xf32>
    %34 = arith.truncf %33 : vector<8x8xf32> to vector<8x8xbf16>
    %c0_25 = arith.constant 0 : index
    %c1_26 = arith.constant 1 : index
    %c0_27 = arith.constant 0 : index
    %c0_28 = arith.constant 0 : index
    %35 = vector.load %arg7[%c0_25, %c1_26, %c0_27, %c0_28] : memref<1x4x8x8xbf16, #tpu.memory_space<vmem>>, vector<1x1x8x8xbf16>
    %36 = vector.shape_cast %35 : vector<1x1x8x8xbf16> to vector<8x8xbf16>
    %37 = vector.shape_cast %34 : vector<8x8xbf16> to vector<1x1x8x8xbf16>
    tpu.vector_store %arg7[%c0_25, %c1_26, %c0_27, %c0_28], %37 {strides = array<i32>} : memref<1x4x8x8xbf16, #tpu.memory_space<vmem>>, vector<1x1x8x8xbf16>,
    %38 = vector.extract_strided_slice %7 {offsets = [0, 16], sizes = [8, 8], strides = [1, 1]} : vector<8x96xf32> to vector<8x8xf32>
    %39 = arith.truncf %38 : vector<8x8xf32> to vector<8x8xbf16>
    %c0_29 = arith.constant 0 : index
    %c2 = arith.constant 2 : index
    %c0_30 = arith.constant 0 : index
    %c0_31 = arith.constant 0 : index
    %40 = vector.load %arg5[%c0_29, %c2, %c0_30, %c0_31] : memref<1x4x8x8xbf16, #tpu.memory_space<vmem>>, vector<1x1x8x8xbf16>
    %41 = vector.shape_cast %40 : vector<1x1x8x8xbf16> to vector<8x8xbf16>
    %42 = vector.shape_cast %39 : vector<8x8xbf16> to vector<1x1x8x8xbf16>
    tpu.vector_store %arg5[%c0_29, %c2, %c0_30, %c0_31], %42 {strides = array<i32>} : memref<1x4x8x8xbf16, #tpu.memory_space<vmem>>, vector<1x1x8x8xbf16>,
    %43 = vector.extract_strided_slice %7 {offsets = [0, 48], sizes = [8, 8], strides = [1, 1]} : vector<8x96xf32> to vector<8x8xf32>
    %44 = arith.truncf %43 : vector<8x8xf32> to vector<8x8xbf16>
    %c0_32 = arith.constant 0 : index
    %c2_33 = arith.constant 2 : index
    %c0_34 = arith.constant 0 : index
    %c0_35 = arith.constant 0 : index
    %45 = vector.load %arg6[%c0_32, %c2_33, %c0_34, %c0_35] : memref<1x4x8x8xbf16, #tpu.memory_space<vmem>>, vector<1x1x8x8xbf16>
    %46 = vector.shape_cast %45 : vector<1x1x8x8xbf16> to vector<8x8xbf16>
    %47 = vector.shape_cast %44 : vector<8x8xbf16> to vector<1x1x8x8xbf16>
    tpu.vector_store %arg6[%c0_32, %c2_33, %c0_34, %c0_35], %47 {strides = array<i32>} : memref<1x4x8x8xbf16, #tpu.memory_space<vmem>>, vector<1x1x8x8xbf16>,
    %48 = vector.extract_strided_slice %7 {offsets = [0, 80], sizes = [8, 8], strides = [1, 1]} : vector<8x96xf32> to vector<8x8xf32>
    %49 = arith.truncf %48 : vector<8x8xf32> to vector<8x8xbf16>
    %c0_36 = arith.constant 0 : index
    %c2_37 = arith.constant 2 : index
    %c0_38 = arith.constant 0 : index
    %c0_39 = arith.constant 0 : index
    %50 = vector.load %arg7[%c0_36, %c2_37, %c0_38, %c0_39] : memref<1x4x8x8xbf16, #tpu.memory_space<vmem>>, vector<1x1x8x8xbf16>
    %51 = vector.shape_cast %50 : vector<1x1x8x8xbf16> to vector<8x8xbf16>
    %52 = vector.shape_cast %49 : vector<8x8xbf16> to vector<1x1x8x8xbf16>
    tpu.vector_store %arg7[%c0_36, %c2_37, %c0_38, %c0_39], %52 {strides = array<i32>} : memref<1x4x8x8xbf16, #tpu.memory_space<vmem>>, vector<1x1x8x8xbf16>,
    %53 = vector.extract_strided_slice %7 {offsets = [0, 24], sizes = [8, 8], strides = [1, 1]} : vector<8x96xf32> to vector<8x8xf32>
    %54 = arith.truncf %53 : vector<8x8xf32> to vector<8x8xbf16>
    %c0_40 = arith.constant 0 : index
    %c3 = arith.constant 3 : index
    %c0_41 = arith.constant 0 : index
    %c0_42 = arith.constant 0 : index
    %55 = vector.load %arg5[%c0_40, %c3, %c0_41, %c0_42] : memref<1x4x8x8xbf16, #tpu.memory_space<vmem>>, vector<1x1x8x8xbf16>
    %56 = vector.shape_cast %55 : vector<1x1x8x8xbf16> to vector<8x8xbf16>
    %57 = vector.shape_cast %54 : vector<8x8xbf16> to vector<1x1x8x8xbf16>
    tpu.vector_store %arg5[%c0_40, %c3, %c0_41, %c0_42], %57 {strides = array<i32>} : memref<1x4x8x8xbf16, #tpu.memory_space<vmem>>, vector<1x1x8x8xbf16>,
    %58 = vector.extract_strided_slice %7 {offsets = [0, 56], sizes = [8, 8], strides = [1, 1]} : vector<8x96xf32> to vector<8x8xf32>
    %59 = arith.truncf %58 : vector<8x8xf32> to vector<8x8xbf16>
    %c0_43 = arith.constant 0 : index
    %c3_44 = arith.constant 3 : index
    %c0_45 = arith.constant 0 : index
    %c0_46 = arith.constant 0 : index
    %60 = vector.load %arg6[%c0_43, %c3_44, %c0_45, %c0_46] : memref<1x4x8x8xbf16, #tpu.memory_space<vmem>>, vector<1x1x8x8xbf16>
    %61 = vector.shape_cast %60 : vector<1x1x8x8xbf16> to vector<8x8xbf16>
    %62 = vector.shape_cast %59 : vector<8x8xbf16> to vector<1x1x8x8xbf16>
    tpu.vector_store %arg6[%c0_43, %c3_44, %c0_45, %c0_46], %62 {strides = array<i32>} : memref<1x4x8x8xbf16, #tpu.memory_space<vmem>>, vector<1x1x8x8xbf16>,
    %63 = vector.extract_strided_slice %7 {offsets = [0, 88], sizes = [8, 8], strides = [1, 1]} : vector<8x96xf32> to vector<8x8xf32>
    %64 = arith.truncf %63 : vector<8x8xf32> to vector<8x8xbf16>
    %c0_47 = arith.constant 0 : index
    %c3_48 = arith.constant 3 : index
    %c0_49 = arith.constant 0 : index
    %c0_50 = arith.constant 0 : index
    %65 = vector.load %arg7[%c0_47, %c3_48, %c0_49, %c0_50] : memref<1x4x8x8xbf16, #tpu.memory_space<vmem>>, vector<1x1x8x8xbf16>
    %66 = vector.shape_cast %65 : vector<1x1x8x8xbf16> to vector<8x8xbf16>
    %67 = vector.shape_cast %64 : vector<8x8xbf16> to vector<1x1x8x8xbf16>
    tpu.vector_store %arg7[%c0_47, %c3_48, %c0_49, %c0_50], %67 {strides = array<i32>} : memref<1x4x8x8xbf16, #tpu.memory_space<vmem>>, vector<1x1x8x8xbf16>,
    return
  }
  func.func @transform_0(%arg0: i32, %arg1: i32) -> (i32, i32, i32) {
    %c0_i32 = arith.constant 0 : i32
    %c0_i32_0 = arith.constant 0 : i32
    return %arg0, %arg1, %c0_i32 : i32, i32, i32
  }
  func.func @transform_1(%arg0: i32, %arg1: i32) -> (i32, i32) {
    %c0_i32 = arith.constant 0 : i32
    %c0_i32_0 = arith.constant 0 : i32
    %c0_i32_1 = arith.constant 0 : i32
    return %c0_i32, %c0_i32_0 : i32, i32
  }
  func.func @transform_2(%arg0: i32, %arg1: i32) -> (i32, i32) {
    %c0_i32 = arith.constant 0 : i32
    %c0_i32_0 = arith.constant 0 : i32
    %c0_i32_1 = arith.constant 0 : i32
    return %c0_i32, %c0_i32_0 : i32, i32
  }
  func.func @transform_3(%arg0: i32, %arg1: i32) -> (i32, i32, i32, i32) {
    %c0_i32 = arith.constant 0 : i32
    %c0_i32_0 = arith.constant 0 : i32
    %c0_i32_1 = arith.constant 0 : i32
    return %arg0, %c0_i32, %arg1, %c0_i32_0 : i32, i32, i32, i32
  }
  func.func @transform_4(%arg0: i32, %arg1: i32) -> (i32, i32, i32, i32) {
    %c0_i32 = arith.constant 0 : i32
    %c0_i32_0 = arith.constant 0 : i32
    %c0_i32_1 = arith.constant 0 : i32
    return %arg0, %c0_i32, %arg1, %c0_i32_0 : i32, i32, i32, i32
  }
  func.func @transform_5(%arg0: i32, %arg1: i32) -> (i32, i32, i32, i32) {
    %c0_i32 = arith.constant 0 : i32
    %c0_i32_0 = arith.constant 0 : i32
    %c0_i32_1 = arith.constant 0 : i32
    return %arg0, %c0_i32, %arg1, %c0_i32_0 : i32, i32, i32, i32
  }
}

module attributes {stable_mosaic.version = 11 : i64} {
  func.func @qkv_proj_kernel(%arg0: i32, %arg1: i32, %arg2: memref<1x8x32xf32, #tpu.memory_space<vmem>>, %arg3: memref<32x96xbf16, #tpu.memory_space<vmem>>, %arg4: memref<1x96xf32, #tpu.memory_space<vmem>>, %arg5: memref<1x4x8x8xbf16, #tpu.memory_space<vmem>>, %arg6: memref<1x4x8x8xbf16, #tpu.memory_space<vmem>>, %arg7: memref<1x4x8x8xbf16, #tpu.memory_space<vmem>>) attributes {dimension_semantics = [#tpu.dimension_semantics<parallel>, #tpu.dimension_semantics<parallel>], iteration_bounds = array<i64: 2, 1>, scalar_prefetch = 0 : i64, scratch_operands = 0 : i64, tpu.core_type = #tpu.core_type<tc>, window_params = [{transform_indices = @transform_0, window_bounds = array<i64: 1, 8, 32>}, {pipeline_mode = #tpu.pipeline_mode<synchronous>, transform_indices = @transform_1, window_bounds = array<i64: 32, 96>}, {pipeline_mode = #tpu.pipeline_mode<synchronous>, transform_indices = @transform_2, window_bounds = array<i64: 1, 96>}, {transform_indices = @transform_3, window_bounds = array<i64: 1, 4, 8, 8>}, {transform_indices = @transform_4, window_bounds = array<i64: 1, 4, 8, 8>}, {transform_indices = @transform_5, window_bounds = array<i64: 1, 4, 8, 8>}]} {
    %c0 = arith.constant 0 : index
    %c0_0 = arith.constant 0 : index
    %c0_1 = arith.constant 0 : index
    %0 = vector.load %arg2[%c0, %c0_0, %c0_1] : memref<1x8x32xf32, #tpu.memory_space<vmem>>, vector<1x8x32xf32>
    %1 = vector.shape_cast %0 : vector<1x8x32xf32> to vector<8x32xf32>
    %c0_2 = arith.constant 0 : index
    %c0_3 = arith.constant 0 : index
    %2 = vector.load %arg3[%c0_2, %c0_3] : memref<32x96xbf16, #tpu.memory_space<vmem>>, vector<32x96xbf16>
    %3 = arith.truncf %1 : vector<8x32xf32> to vector<8x32xbf16>
    %cst = arith.constant dense<0.000000e+00> : vector<8x96xf32>
    %4 = tpu.matmul %3, %2, %cst {dimension_numbers = #tpu.dot_dimension_numbers<[1], [0], [0], [1], [0, 0, 1, 1], [], []>} : vector<8x32xbf16>, vector<32x96xbf16>, vector<8x96xf32> -> vector<8x96xf32>
    %c0_4 = arith.constant 0 : index
    %c0_5 = arith.constant 0 : index
    %5 = vector.load %arg4[%c0_4, %c0_5] : memref<1x96xf32, #tpu.memory_space<vmem>>, vector<1x96xf32>
    %6 = vector.broadcast %5 : vector<1x96xf32> to vector<8x96xf32>
    %7 = arith.addf %4, %6 : vector<8x96xf32>
    %8 = vector.extract_strided_slice %7 {offsets = [0, 0], sizes = [8, 8], strides = [1, 1]} : vector<8x96xf32> to vector<8x8xf32>
    %9 = arith.truncf %8 : vector<8x8xf32> to vector<8x8xbf16>
    %c0_6 = arith.constant 0 : index
    %c0_7 = arith.constant 0 : index
    %c0_8 = arith.constant 0 : index
    %c0_9 = arith.constant 0 : index
    %10 = vector.load %arg5[%c0_6, %c0_7, %c0_8, %c0_9] : memref<1x4x8x8xbf16, #tpu.memory_space<vmem>>, vector<1x1x8x8xbf16>
    %11 = vector.shape_cast %10 : vector<1x1x8x8xbf16> to vector<8x8xbf16>
    %12 = vector.shape_cast %9 : vector<8x8xbf16> to vector<1x1x8x8xbf16>
    tpu.vector_store %arg5[%c0_6, %c0_7, %c0_8, %c0_9], %12 {strides = array<i32>} : memref<1x4x8x8xbf16, #tpu.memory_space<vmem>>, vector<1x1x8x8xbf16>,
    %13 = vector.extract_strided_slice %7 {offsets = [0, 32], sizes = [8, 8], strides = [1, 1]} : vector<8x96xf32> to vector<8x8xf32>
    %14 = arith.truncf %13 : vector<8x8xf32> to vector<8x8xbf16>
    %c0_10 = arith.constant 0 : index
    %c0_11 = arith.constant 0 : index
    %c0_12 = arith.constant 0 : index
    %c0_13 = arith.constant 0 : index
    %15 = vector.load %arg6[%c0_10, %c0_11, %c0_12, %c0_13] : memref<1x4x8x8xbf16, #tpu.memory_space<vmem>>, vector<1x1x8x8xbf16>
    %16 = vector.shape_cast %15 : vector<1x1x8x8xbf16> to vector<8x8xbf16>
    %17 = vector.shape_cast %14 : vector<8x8xbf16> to vector<1x1x8x8xbf16>
    tpu.vector_store %arg6[%c0_10, %c0_11, %c0_12, %c0_13], %17 {strides = array<i32>} : memref<1x4x8x8xbf16, #tpu.memory_space<vmem>>, vector<1x1x8x8xbf16>,
    %18 = vector.extract_strided_slice %7 {offsets = [0, 64], sizes = [8, 8], strides = [1, 1]} : vector<8x96xf32> to vector<8x8xf32>
    %19 = arith.truncf %18 : vector<8x8xf32> to vector<8x8xbf16>
    %c0_14 = arith.constant 0 : index
    %c0_15 = arith.constant 0 : index
    %c0_16 = arith.constant 0 : index
    %c0_17 = arith.constant 0 : index
    %20 = vector.load %arg7[%c0_14, %c0_15, %c0_16, %c0_17] : memref<1x4x8x8xbf16, #tpu.memory_space<vmem>>, vector<1x1x8x8xbf16>
    %21 = vector.shape_cast %20 : vector<1x1x8x8xbf16> to vector<8x8xbf16>
    %22 = vector.shape_cast %19 : vector<8x8xbf16> to vector<1x1x8x8xbf16>
    tpu.vector_store %arg7[%c0_14, %c0_15, %c0_16, %c0_17], %22 {strides = array<i32>} : memref<1x4x8x8xbf16, #tpu.memory_space<vmem>>, vector<1x1x8x8xbf16>,
    %23 = vector.extract_strided_slice %7 {offsets = [0, 8], sizes = [8, 8], strides = [1, 1]} : vector<8x96xf32> to vector<8x8xf32>
    %24 = arith.truncf %23 : vector<8x8xf32> to vector<8x8xbf16>
    %c0_18 = arith.constant 0 : index
    %c1 = arith.constant 1 : index
    %c0_19 = arith.constant 0 : index
    %c0_20 = arith.constant 0 : index
    %25 = vector.load %arg5[%c0_18, %c1, %c0_19, %c0_20] : memref<1x4x8x8xbf16, #tpu.memory_space<vmem>>, vector<1x1x8x8xbf16>
    %26 = vector.shape_cast %25 : vector<1x1x8x8xbf16> to vector<8x8xbf16>
    %27 = vector.shape_cast %24 : vector<8x8xbf16> to vector<1x1x8x8xbf16>
    tpu.vector_store %arg5[%c0_18, %c1, %c0_19, %c0_20], %27 {strides = array<i32>} : memref<1x4x8x8xbf16, #tpu.memory_space<vmem>>, vector<1x1x8x8xbf16>,
    %28 = vector.extract_strided_slice %7 {offsets = [0, 40], sizes = [8, 8], strides = [1, 1]} : vector<8x96xf32> to vector<8x8xf32>
    %29 = arith.truncf %28 : vector<8x8xf32> to vector<8x8xbf16>
    %c0_21 = arith.constant 0 : index
    %c1_22 = arith.constant 1 : index
    %c0_23 = arith.constant 0 : index
    %c0_24 = arith.constant 0 : index
    %30 = vector.load %arg6[%c0_21, %c1_22, %c0_23, %c0_24] : memref<1x4x8x8xbf16, #tpu.memory_space<vmem>>, vector<1x1x8x8xbf16>
    %31 = vector.shape_cast %30 : vector<1x1x8x8xbf16> to vector<8x8xbf16>
    %32 = vector.shape_cast %29 : vector<8x8xbf16> to vector<1x1x8x8xbf16>
    tpu.vector_store %arg6[%c0_21, %c1_22, %c0_23, %c0_24], %32 {strides = array<i32>} : memref<1x4x8x8xbf16, #tpu.memory_space<vmem>>, vector<1x1x8x8xbf16>,
    %33 = vector.extract_strided_slice %7 {offsets = [0, 72], sizes = [8, 8], strides = [1, 1]} : vector<8x96xf32> to vector<8x8xf32>
    %34 = arith.truncf %33 : vector<8x8xf32> to vector<8x8xbf16>
    %c0_25 = arith.constant 0 : index
    %c1_26 = arith.constant 1 : index
    %c0_27 = arith.constant 0 : index
    %c0_28 = arith.constant 0 : index
    %35 = vector.load %arg7[%c0_25, %c1_26, %c0_27, %c0_28] : memref<1x4x8x8xbf16, #tpu.memory_space<vmem>>, vector<1x1x8x8xbf16>
    %36 = vector.shape_cast %35 : vector<1x1x8x8xbf16> to vector<8x8xbf16>
    %37 = vector.shape_cast %34 : vector<8x8xbf16> to vector<1x1x8x8xbf16>
    tpu.vector_store %arg7[%c0_25, %c1_26, %c0_27, %c0_28], %37 {strides = array<i32>} : memref<1x4x8x8xbf16, #tpu.memory_space<vmem>>, vector<1x1x8x8xbf16>,
    %38 = vector.extract_strided_slice %7 {offsets = [0, 16], sizes = [8, 8], strides = [1, 1]} : vector<8x96xf32> to vector<8x8xf32>
    %39 = arith.truncf %38 : vector<8x8xf32> to vector<8x8xbf16>
    %c0_29 = arith.constant 0 : index
    %c2 = arith.constant 2 : index
    %c0_30 = arith.constant 0 : index
    %c0_31 = arith.constant 0 : index
    %40 = vector.load %arg5[%c0_29, %c2, %c0_30, %c0_31] : memref<1x4x8x8xbf16, #tpu.memory_space<vmem>>, vector<1x1x8x8xbf16>
    %41 = vector.shape_cast %40 : vector<1x1x8x8xbf16> to vector<8x8xbf16>
    %42 = vector.shape_cast %39 : vector<8x8xbf16> to vector<1x1x8x8xbf16>
    tpu.vector_store %arg5[%c0_29, %c2, %c0_30, %c0_31], %42 {strides = array<i32>} : memref<1x4x8x8xbf16, #tpu.memory_space<vmem>>, vector<1x1x8x8xbf16>,
    %43 = vector.extract_strided_slice %7 {offsets = [0, 48], sizes = [8, 8], strides = [1, 1]} : vector<8x96xf32> to vector<8x8xf32>
    %44 = arith.truncf %43 : vector<8x8xf32> to vector<8x8xbf16>
    %c0_32 = arith.constant 0 : index
    %c2_33 = arith.constant 2 : index
    %c0_34 = arith.constant 0 : index
    %c0_35 = arith.constant 0 : index
    %45 = vector.load %arg6[%c0_32, %c2_33, %c0_34, %c0_35] : memref<1x4x8x8xbf16, #tpu.memory_space<vmem>>, vector<1x1x8x8xbf16>
    %46 = vector.shape_cast %45 : vector<1x1x8x8xbf16> to vector<8x8xbf16>
    %47 = vector.shape_cast %44 : vector<8x8xbf16> to vector<1x1x8x8xbf16>
    tpu.vector_store %arg6[%c0_32, %c2_33, %c0_34, %c0_35], %47 {strides = array<i32>} : memref<1x4x8x8xbf16, #tpu.memory_space<vmem>>, vector<1x1x8x8xbf16>,
    %48 = vector.extract_strided_slice %7 {offsets = [0, 80], sizes = [8, 8], strides = [1, 1]} : vector<8x96xf32> to vector<8x8xf32>
    %49 = arith.truncf %48 : vector<8x8xf32> to vector<8x8xbf16>
    %c0_36 = arith.constant 0 : index
    %c2_37 = arith.constant 2 : index
    %c0_38 = arith.constant 0 : index
    %c0_39 = arith.constant 0 : index
    %50 = vector.load %arg7[%c0_36, %c2_37, %c0_38, %c0_39] : memref<1x4x8x8xbf16, #tpu.memory_space<vmem>>, vector<1x1x8x8xbf16>
    %51 = vector.shape_cast %50 : vector<1x1x8x8xbf16> to vector<8x8xbf16>
    %52 = vector.shape_cast %49 : vector<8x8xbf16> to vector<1x1x8x8xbf16>
    tpu.vector_store %arg7[%c0_36, %c2_37, %c0_38, %c0_39], %52 {strides = array<i32>} : memref<1x4x8x8xbf16, #tpu.memory_space<vmem>>, vector<1x1x8x8xbf16>,
    %53 = vector.extract_strided_slice %7 {offsets = [0, 24], sizes = [8, 8], strides = [1, 1]} : vector<8x96xf32> to vector<8x8xf32>
    %54 = arith.truncf %53 : vector<8x8xf32> to vector<8x8xbf16>
    %c0_40 = arith.constant 0 : index
    %c3 = arith.constant 3 : index
    %c0_41 = arith.constant 0 : index
    %c0_42 = arith.constant 0 : index
    %55 = vector.load %arg5[%c0_40, %c3, %c0_41, %c0_42] : memref<1x4x8x8xbf16, #tpu.memory_space<vmem>>, vector<1x1x8x8xbf16>
    %56 = vector.shape_cast %55 : vector<1x1x8x8xbf16> to vector<8x8xbf16>
    %57 = vector.shape_cast %54 : vector<8x8xbf16> to vector<1x1x8x8xbf16>
    tpu.vector_store %arg5[%c0_40, %c3, %c0_41, %c0_42], %57 {strides = array<i32>} : memref<1x4x8x8xbf16, #tpu.memory_space<vmem>>, vector<1x1x8x8xbf16>,
    %58 = vector.extract_strided_slice %7 {offsets = [0, 56], sizes = [8, 8], strides = [1, 1]} : vector<8x96xf32> to vector<8x8xf32>
    %59 = arith.truncf %58 : vector<8x8xf32> to vector<8x8xbf16>
    %c0_43 = arith.constant 0 : index
    %c3_44 = arith.constant 3 : index
    %c0_45 = arith.constant 0 : index
    %c0_46 = arith.constant 0 : index
    %60 = vector.load %arg6[%c0_43, %c3_44, %c0_45, %c0_46] : memref<1x4x8x8xbf16, #tpu.memory_space<vmem>>, vector<1x1x8x8xbf16>
    %61 = vector.shape_cast %60 : vector<1x1x8x8xbf16> to vector<8x8xbf16>
    %62 = vector.shape_cast %59 : vector<8x8xbf16> to vector<1x1x8x8xbf16>
    tpu.vector_store %arg6[%c0_43, %c3_44, %c0_45, %c0_46], %62 {strides = array<i32>} : memref<1x4x8x8xbf16, #tpu.memory_space<vmem>>, vector<1x1x8x8xbf16>,
    %63 = vector.extract_strided_slice %7 {offsets = [0, 88], sizes = [8, 8], strides = [1, 1]} : vector<8x96xf32> to vector<8x8xf32>
    %64 = arith.truncf %63 : vector<8x8xf32> to vector<8x8xbf16>
    %c0_47 = arith.constant 0 : index
    %c3_48 = arith.constant 3 : index
    %c0_49 = arith.constant 0 : index
    %c0_50 = arith.constant 0 : index
    %65 = vector.load %arg7[%c0_47, %c3_48, %c0_49, %c0_50] : memref<1x4x8x8xbf16, #tpu.memory_space<vmem>>, vector<1x1x8x8xbf16>
    %66 = vector.shape_cast %65 : vector<1x1x8x8xbf16> to vector<8x8xbf16>
    %67 = vector.shape_cast %64 : vector<8x8xbf16> to vector<1x1x8x8xbf16>
    tpu.vector_store %arg7[%c0_47, %c3_48, %c0_49, %c0_50], %67 {strides = array<i32>} : memref<1x4x8x8xbf16, #tpu.memory_space<vmem>>, vector<1x1x8x8xbf16>,
    return
  }
  func.func @transform_0(%arg0: i32, %arg1: i32) -> (i32, i32, i32) {
    %c0_i32 = arith.constant 0 : i32
    %c0_i32_0 = arith.constant 0 : i32
    return %arg0, %arg1, %c0_i32 : i32, i32, i32
  }
  func.func @transform_1(%arg0: i32, %arg1: i32) -> (i32, i32) {
    %c0_i32 = arith.constant 0 : i32
    %c0_i32_0 = arith.constant 0 : i32
    %c0_i32_1 = arith.constant 0 : i32
    return %c0_i32, %c0_i32_0 : i32, i32
  }
  func.func @transform_2(%arg0: i32, %arg1: i32) -> (i32, i32) {
    %c0_i32 = arith.constant 0 : i32
    %c0_i32_0 = arith.constant 0 : i32
    %c0_i32_1 = arith.constant 0 : i32
    return %c0_i32, %c0_i32_0 : i32, i32
  }
  func.func @transform_3(%arg0: i32, %arg1: i32) -> (i32, i32, i32, i32) {
    %c0_i32 = arith.constant 0 : i32
    %c0_i32_0 = arith.constant 0 : i32
    %c0_i32_1 = arith.constant 0 : i32
    return %arg0, %c0_i32, %arg1, %c0_i32_0 : i32, i32, i32, i32
  }
  func.func @transform_4(%arg0: i32, %arg1: i32) -> (i32, i32, i32, i32) {
    %c0_i32 = arith.constant 0 : i32
    %c0_i32_0 = arith.constant 0 : i32
    %c0_i32_1 = arith.constant 0 : i32
    return %arg0, %c0_i32, %arg1, %c0_i32_0 : i32, i32, i32, i32
  }
  func.func @transform_5(%arg0: i32, %arg1: i32) -> (i32, i32, i32, i32) {
    %c0_i32 = arith.constant 0 : i32
    %c0_i32_0 = arith.constant 0 : i32
    %c0_i32_1 = arith.constant 0 : i32
    return %arg0, %c0_i32, %arg1, %c0_i32_0 : i32, i32, i32, i32
  }
}

</mosaic_0001>

<bundles_post_ra>
// kernel: tpu_custom_call.1
= control target key start
LH: loop header
LB: loop body
LE: loop exit
PB: predicated region body
PF: predicated region fallthrough
CT: control target
= control target key end

     0   :  { %11 = vsyncpa [#allocation3], 0  ;;  %s1381_s0 = inlined_call_operand.hbm [shape: f32[2,8,32], index: 0, kind: input, shape index: {}]   ;;  %s1382_s1 = inlined_call_operand.hbm [shape: bf16[32,96], index: 1, kind: input, shape index: {}]   ;;  %s1383_s2 = inlined_call_operand.vmem [shape: f32[1,96], index: 2, kind: input, shape index: {}]   ;;  %s1384_s3 = inlined_call_operand.hbm [shape: bf16[2,4,8,8], index: 3, kind: output, shape index: {0}]   ;;  %s1385_s4 = inlined_call_operand.hbm [shape: bf16[2,4,8,8], index: 4, kind: output, shape index: {1}]   ;;  %s1386_s5 = inlined_call_operand.hbm [shape: bf16[2,4,8,8], index: 5, kind: output, shape index: {2}]  }
   0x1   :  { %13 = vsyncpa [#allocation3 + $0x1], 0 }
   0x2   :  { %14 = vsyncpa [#allocation6], 0 }
   0x3   :  { %15 = vsyncpa [#allocation4], 0 }
   0x4   :  { %17 = vsyncpa [#allocation4 + $0x1], 0 }
   0x5   :  { %18 = vsyncpa [#allocation9], 0 }
   0x6   :  { %20 = vsyncpa [#allocation9 + $0x1], 0  ;;  %s1052_s18 = smov 0   ;;  %s1054_s19 = smov 0  }
   0x7   :  { %s1056_s20 = smov 0   ;;  %s1058_s21 = smov 0  }
   0x8   :  { %s1060_s22 = smov 0   ;;  %s1062_s23 = smov 0  }
   0x9 LB: > { %s1083_s24 = sadd.s32 4294967295, %s999_s23   ;;  %s1390_s25 = sadd.s32 4294967294, %s999_s23   ;;  %s999_s23 = sphi %s1062_s23, %s26_s23   ;;  %s995_s22 = sphi %s1060_s22, %s1412_s22   ;;  %s991_s21 = sphi %s1058_s21, %s1411_s21   ;;  %s987_s20 = sphi %s1056_s20, %s1410_s20   ;;  %s983_s19 = sphi %s1054_s19, %s1409_s19   ;;  %s979_s18 = sphi %s1052_s18, %s1408_s18  }
   0xa   : > { %p60_p0 = scmp.ne.s32.totalorder %s983_s19, %s979_s18  ;;  %p1387_p1 = scmp.eq.s32.totalorder %s1083_s24, 0 }
   0xb   : > { %p134_p3 = scmp.eq.s32.totalorder %s1390_s25, 1  ;;  %p643_p5 = scmp.ge.s32.totalorder %s999_s23, 1 }
   0xc   : > { %p1094_p4 = por %p1387_p1, %p60_p0  ;;  %p197_p7 = scmp.lt.s32.totalorder %s999_s23, 3 }
   0xd   : > { %p1099_p6 = por %p134_p3, %p60_p0  ;;  %s1001_s29 = smov [#allocation5]  }
   0xe   : > { %s1391_s26 = scalar_select %p1094_p4, 1, 0 }
   0xf   : > { %s1392_s27 = scalar_select %p1099_p6, 1, 0 }
  0x10   : > { %p1104_p8 = pnand %p643_p5, %p197_p7  ;;  %s209_s30 = sshll.u32 %s1001_s29, 4  ;;  %s210_s30 = int_to_ptr.vmem [resolvable:$true] %s209_s30 }
  0x11   : > { %s38_s7 = sadd.s32 1, %s995_s22  ;;  %s795_s10 = scalar_lea.hbm %s1382_s1, 256 }
  0x12   : > { %s1393_s28 = scalar_select %p1104_p8, 1, 0 }
  0x13   : > { %p706_p9 = pneg %p1104_p8  ;;  %p796_p12 = scmp.ne.s32.totalorder %s1382_s1, %s795_s10 }
  0x14   : > { %p802_p5 = scmp.lt.u32.totalorder %s795_s10, %s1382_s1 }
  0x15   : > { %p1113_p11 = pnand %p706_p9, %p1387_p1 }
  0x17   : > { %p797_p13 = pneg %p1113_p11 }
  0x19   : > { %p798_p0 = pnand %p797_p13, %p796_p12 }
  0x1b   : > { %p799_p3 = pneg %p798_p0 }
  0x1d   : > { %p804_p7 = pnand %p802_p5, %p799_p3 }
  0x1f   : > { %807 = shalt.err (!%p804_p7)
}
  0x20   : > { %s808_s15 = scalar_lea.vmem %s210_s30, 256  ;;  %p816_p2 = scmp.lt.s32.totalorder %s210_s30, %s210_s30 }
  0x21   : > { %p809_p9 = scmp.ne.s32.totalorder %s210_s30, %s808_s15  ;;  %p817_p6 = scmp.lt.s32.totalorder %s808_s15, %s808_s15 }
  0x23   : > { %p811_p10 = pnand %p809_p9, %p797_p13  ;;  %p818_p4 = por %p817_p6, %p816_p2 }
  0x25   : > { %p812_p1 = pneg %p811_p10 }
  0x27   : > { %p819_p8 = pnand %p818_p4, %p812_p1 }
  0x29   : > { %822 = shalt.err (!%p819_p8)
}
  0x2a   : > { %s1002_s16 = smov 64   ;;  %s1003_s17 = smov 4  }
  0x2b   : > { %709 = dma.hbm_to_vmem [thread:$0]  (!%p1113_p11), %s1382_s1, 256, %s210_s30, [#allocation6], %s1002_s16, %s1002_s16, %s1003_s17  }
  0x2c   : > { %p40_p1 = scmp.ge.s32.totalorder %s38_s7, 2  ;;  %s47_s9 = sadd.s32 1, %s987_s20 }
  0x2d   : > { %p54_p2 = scmp.ne.s32.totalorder %s987_s20, %s983_s19  ;;  %p55_p4 = scmp.eq.s32.totalorder %s999_s23, 0 }
  0x2e   : > { %s1414_s7 = smov (%p40_p1, %s38_s7), 0  ;;  %p1396_p8 = scmp.eq.s32.totalorder %s1083_s24, 1 }
  0x2f   : > { %p1140_p6 = por %p55_p4, %p54_p2  ;;  %s42_s6 = ssub.s32 %s995_s22, %s1414_s7 }
  0x30   : > { %p1146_p10 = por %p1396_p8, %p54_p2  ;;  %p725_p12 = scmp.lt.s32.totalorder %s999_s23, 2 }
  0x31   : > { %p45_p11 = scmp.eq.s32.totalorder %s42_s6, 0  ;;  %s226_s30 = sand.u32 1, %s987_s20  }
  0x32   : > { %s646_s12 = sshll.u32 %s226_s30, 3  ;;  %s647_s14 = sshll.u32 %s995_s22, 7 }
  0x33   : > { %s1155_s13 = scalar_select %p45_p11, %s987_s20, %s47_s9  }
  0x34   : > { %s1161_s17 = scalar_lea.hbm %s1381_s0, %s647_s14  ;;  %s230_s29 = scalar_lea.vmem [#allocation2], %s646_s12 }
  0x35   : > { %s238_s8 = sshll.u32 %s230_s29, 4  ;;  %p1167_p13 = pnand %p725_p12, %p1140_p6  ;;  %s1163_s8 = int_to_ptr.vmem [resolvable:$true] %s238_s8 }
  0x36   : > { %s227_s9 = scalar_lea.sflag [#allocation3], %s226_s30  ;;  %s823_s25 = scalar_lea.hbm %s1161_s17, 128 }
  0x37   : > { %p824_p0 = scmp.ne.s32.totalorder %s1161_s17, %s823_s25  ;;  %p825_p3 = pneg %p1167_p13 }
  0x38   : > { %s828_s15 = scalar_lea.hbm %s1381_s0, 256  ;;  %p829_p9 = scmp.lt.u32.totalorder %s1161_s17, %s1381_s0 }
  0x39   : > { %p826_p5 = pnand %p825_p3, %p824_p0  ;;  %p830_p1 = scmp.lt.u32.totalorder %s828_s15, %s823_s25 }
  0x3a   : > { %p832_p4 = scmp.lt.u32.totalorder %s823_s25, %s1161_s17 }
  0x3b   : > { %p827_p7 = pneg %p826_p5  ;;  %p831_p2 = por %p830_p1, %p829_p9 }
  0x3d   : > { %p833_p6 = por %p832_p4, %p831_p2 }
  0x3f   : > { %p834_p8 = pnand %p833_p6, %p827_p7 }
  0x41   : > { %837 = shalt.err (!%p834_p8)
}
  0x42   : > { %s838_s30 = scalar_lea.vmem %s1163_s8, 128  ;;  %s1004_s29 = smov [#allocation2]  }
  0x43   : > { %p839_p12 = scmp.ne.s32.totalorder %s1163_s8, %s838_s30  ;;  %s843_s12 = sshll.u32 %s1004_s29, 4  ;;  %s844_s12 = int_to_ptr.vmem [resolvable:$false] %s843_s12 }
  0x44   : > { %s845_s14 = scalar_lea.vmem %s844_s12, 256  ;;  %p846_p5 = scmp.lt.s32.totalorder %s1163_s8, %s844_s12 }
  0x45   : > { %p841_p11 = pnand %p839_p12, %p825_p3  ;;  %p847_p9 = scmp.lt.s32.totalorder %s845_s14, %s838_s30 }
  0x47   : > { %p842_p0 = pneg %p841_p11  ;;  %p848_p1 = por %p847_p9, %p846_p5 }
  0x49   : > { %p849_p2 = pnand %p848_p1, %p842_p0 }
  0x4b   : > { %852 = shalt.err (!%p849_p2)
}
  0x4c   : > { %713 = dma.hbm_to_vmem [thread:$0]  (!%p1167_p13), %s1161_s17, 128, %s1163_s8, %s227_s9  }
  0x4d   : > { %p1399_p7 = scmp.ne.s32.totalorder %s1393_s28, 0 }
  0x4e   : > { %s1199_s25 = sand.u32 (!%p1399_p7), 1, %s983_s19   ;;  %p1400_p3 = scmp.ne.s32.totalorder (!%p1399_p7), %s1391_s26, 0 }
  0x4f   : > { %247 = sbr.rel (%p1399_p7) target bundleno = 496 (0x1f0), region = 32  ;;  %s649_s15 = sshll.u32 (!%p1399_p7), %s1199_s25, 3 }
  0x50   : > { %s250_s10 = scalar_lea.sflag (!%p1399_p7), [#allocation3], %s1199_s25  ;;  %s253_s16 = scalar_lea.vmem (!%p1399_p7), [#allocation2], %s649_s15 }
  0x56   : > { %962 = dma.done.wait (%p1400_p3), %s250_s10, 128  }
  0x57   : > { %964 = vsyncadd (%p1400_p3), %s250_s10, 4294967168  ;;  %p1401_p4 = scmp.eq.s32.totalorder %s1083_s24, 0 }
  0x59   : > { %966 = dma.done.wait (%p1401_p4), [#allocation6], 256   ;;  %p1402_p13 = pmov %p1401_p4 }
  0x5a   : > { %v1005_v0 = vmov 0.0   ;;  %vm1006_vm0 = vmmov 0   ;;  %v793_v1 = vld [vmem:[#allocation5] sm:$0xff]   ;;  %v794_v2 = vld [vmem:[#allocation5 + $0x8] sm:$0xff]   ;;  %v295_v3 = vld [vmem:[%s253_s16] sm:$0xff]  ;;  %vm320_vm1 = vcmask 261120  }
  0x5b   : > { %968 = vsyncadd (%p1402_p13), [#allocation6], 4294967040  ;;  %686 = vmatprep.subr.bf16.mxu0 %v1005_v0  ;;  %690 = vmatprep.mubr.msk.bf16.mxu0 %vm1006_vm0, %v1005_v0  ;;  %v300_v4 = vpack.c.bf16 %v295_v3, %v295_v3  ;;  %v654_v5 = vld [vmem:[%s1383_s2] ss:$0 sm:$0xff]  ;;  %s1215_s17 = sshll.u32 %s1199_s25, 4  ;;  %vm365_vm2 = vcmask 60416  }
  0x5c   : > { %687 = vmatpush3.bf16.msra.mxu0 %v793_v1  ;;  %s1007_s8 = smov 80   ;;  %s1008_s6 = smov 96  }
  0x5d   : > { %688 = vmatprep.subr.bf16.mxu0 %v1005_v0  ;;  %s1218_s9 = scalar_lea.vmem [#allocation7], %s1215_s17  ;;  %s1009_s30 = smov 72  }
  0x5e   : > { %s1010_s29 = smov 88   ;;  %s1011_s12 = smov 120  }
  0x5f   : > { %s1012_s14 = smov 64   ;;  %s1013_s15 = smov 112  }
  0x60   : > { %689 = vmatpush3.bf16.msra.mxu0 %v794_v2  ;;  %s1014_s10 = smov 56   ;;  %s1015_s16 = smov 104  }
  0x61   : > { %s1016_s26 = smov 48   ;;  %s1017_s28 = smov 40  }
  0x63   : > { %691 = vmatmul.mubr.msk.bf16.vlgmr.msra.gmra.mrb[0].mxu0 %vm320_vm1, %v300_v4 }
 0x136   : > { %v358_v6 = vpop.f32.mrb[0].mxu0 }
 0x137   : > { %v359_v7 = vadd.f32 %v654_v5, %v358_v6  ;;  %v692_v8 = vpop.f32.mrb[1].mxu0 }
 0x138   : > { %v361_v9 = vpop.f32.mrb[2].mxu0 }
 0x139   : > { %v364_v10 = vpack.c.bf16 %v359_v7, %v359_v7  ;;  %v693_v11 = vpop.f32.mrb[3].mxu0 }
 0x13b   : > { %398 = vrot.lane.b32.xlu1 %v364_v10, %s1007_s8  ;;  %370 = vrot.lane.b32.xlu0 %v364_v10, %s1008_s6  ;;  %366 = vst.msk [vmem:[%s1218_s9] sm:$0xf] %vm365_vm2, %v364_v10  ;;  %s286_s8 = scalar_lea.vmem [#allocation8], %s1215_s17 }
 0x13c   : > { %s465_s6 = sshll.u32 %s286_s8, 4  ;;  %s1230_s6 = int_to_ptr.vmem [resolvable:$true] %s465_s6 }
 0x13f   : > { %413 = vrot.lane.b32.xlu1 %v364_v10, %s1009_s30  ;;  %383 = vrot.lane.b32.xlu0 %v364_v10, %s1010_s29  ;;  %s428_s30 = sand.u32 1, %s1083_s24   ;;  %s1226_s29 = sshll.u32 %s991_s21, 8 }
 0x140   : > { %s1240_s21 = scalar_lea.sflag [#allocation9], %s428_s30  ;;  %s853_s24 = scalar_lea.vmem %s1230_s6, 256 }
 0x141   : > { %p854_p6 = scmp.ne.s32.totalorder %s1230_s6, %s853_s24 }
 0x143   : > { %378 = vrot.lane.b32.xlu1 %v364_v10, %s1011_s12  ;;  %374 = vrot.lane.b32.xlu0 %v364_v10, %s1012_s14  ;;  %p855_p8 = pnand %p854_p6, %p1146_p10 }
 0x145   : > { %p856_p12 = pneg %p855_p8 }
 0x147   : > { %393 = vrot.lane.b32.xlu1 %v364_v10, %s1013_s15  ;;  %388 = vrot.lane.b32.xlu0 %v364_v10, %s1014_s10  ;;  %s1236_s10 = scalar_lea.hbm %s1385_s4, %s1226_s29 }
 0x14b   : > { %408 = vrot.lane.b32.xlu1 %v364_v10, %s1015_s16  ;;  %403 = vrot.lane.b32.xlu0 %v364_v10, %s1016_s26  ;;  %s1018_s16 = smov [#allocation8]  }
 0x14c   : > { %s857_s26 = sshll.u32 %s1018_s16, 4  ;;  %s858_s26 = int_to_ptr.vmem [resolvable:$false] %s857_s26 }
 0x14d   : > { %p860_p11 = scmp.lt.s32.totalorder %s1230_s6, %s858_s26 }
 0x14f   : > { %418 = vrot.lane.b32.xlu0 %v364_v10, %s1017_s28  ;;  %s859_s28 = scalar_lea.vmem %s858_s26, 512 }
 0x150   : > { %p861_p0 = scmp.lt.s32.totalorder %s859_s28, %s853_s24 }
 0x152   : > { %p862_p5 = por %p861_p0, %p860_p11 }
 0x154   : > { %p863_p9 = pnand %p862_p5, %p856_p12 }
 0x1ad   : > { %v399_v12 = vpop.permute.xlu1 %398  ;;  %v371_v13 = vpop.permute.xlu0 %370 }
 0x1ae   : > { %663 = vst.msk [vmem:[%s286_s8 + $0x8] sm:$0xf] %vm365_vm2, %v399_v12  ;;  %373 = vst.msk [vmem:[%s286_s8] sm:$0xf] %vm365_vm2, %v371_v13 }
 0x1b1   : > { %v414_v14 = vpop.permute.xlu1 %413  ;;  %v384_v15 = vpop.permute.xlu0 %383 }
 0x1b2   : > { %666 = vst.msk [vmem:[%s286_s8 + $0xc] sm:$0xf] %vm365_vm2, %v414_v14  ;;  %660 = vst.msk [vmem:[%s286_s8 + $0x4] sm:$0xf] %vm365_vm2, %v384_v15 }
 0x1b3   : > { %866 = shalt.err (!%p863_p9)
}
 0x1b4   : > { %s867_s8 = scalar_lea.hbm %s1236_s10, 256  ;;  %s871_s15 = scalar_lea.hbm %s1385_s4, 512 }
 0x1b5   : > { %p868_p1 = scmp.ne.s32.totalorder %s1236_s10, %s867_s8  ;;  %p872_p3 = scmp.lt.u32.totalorder %s1236_s10, %s1385_s4 }
 0x1b6   : > { %p873_p4 = scmp.lt.u32.totalorder %s871_s15, %s867_s8  ;;  %p875_p6 = scmp.lt.u32.totalorder %s867_s8, %s1236_s10 }
 0x1b7   : > { %p869_p2 = pnand %p868_p1, %p1146_p10 }
 0x1b8   : > { %p874_p13 = por %p873_p4, %p872_p3 }
 0x1b9   : > { %p870_p7 = pneg %p869_p2 }
 0x1ba   : > { %p876_p8 = por %p875_p6, %p874_p13 }
 0x1bc   : > { %p877_p12 = pnand %p876_p8, %p870_p7 }
 0x1be   : > { %880 = shalt.err (!%p877_p12)
}
 0x1bf   : > { %s1019_s24 = smov 4   ;;  %v379_v16 = vpop.permute.xlu1 %378  ;;  %v375_v17 = vpop.permute.xlu0 %374  ;;  %s1270_s28 = scalar_lea.vmem [#allocation10], %s1215_s17 }
 0x1c0   : > { %701 = dma.vmem_to_hbm [thread:$0]  (%p1146_p10), %s1230_s6, 256, %s1236_s10, %s1240_s21, %s1012_s14, %s1012_s14, %s1019_s24  }
 0x1c1   : > { %659 = vst.msk [vmem:[%s1218_s9 + $0x4] sm:$0xf] %vm365_vm2, %v379_v16  ;;  %377 = vst.msk [vmem:[%s1270_s28] sm:$0xf] %vm365_vm2, %v375_v17  ;;  %s448_s8 = sshll.u32 %s1218_s9, 4  ;;  %s1285_s17 = scalar_lea.hbm %s1384_s3, %s1226_s29  ;;  %s1279_s8 = int_to_ptr.vmem [resolvable:$true] %s448_s8 }
 0x1c2   : > { %s881_s15 = scalar_lea.vmem %s1279_s8, 256  ;;  %s1020_s16 = smov [#allocation7]  }
 0x1c3   : > { %v394_v18 = vpop.permute.xlu1 %393  ;;  %v389_v19 = vpop.permute.xlu0 %388  ;;  %p882_p11 = scmp.ne.s32.totalorder %s1279_s8, %s881_s15  ;;  %s885_s26 = sshll.u32 %s1020_s16, 4  ;;  %s886_s26 = int_to_ptr.vmem [resolvable:$false] %s885_s26 }
 0x1c4   : > { %662 = vst.msk [vmem:[%s1218_s9 + $0x8] sm:$0xf] %vm365_vm2, %v394_v18  ;;  %661 = vst.msk [vmem:[%s1270_s28 + $0x4] sm:$0xf] %vm365_vm2, %v389_v19  ;;  %s887_s6 = scalar_lea.vmem %s886_s26, 512  ;;  %p888_p9 = scmp.lt.s32.totalorder %s1279_s8, %s886_s26 }
 0x1c5   : > { %p883_p0 = pnand %p882_p11, %p1146_p10  ;;  %p889_p1 = scmp.lt.s32.totalorder %s887_s6, %s881_s15 }
 0x1c7   : > { %v409_v20 = vpop.permute.xlu1 %408  ;;  %v404_v21 = vpop.permute.xlu0 %403  ;;  %p884_p5 = pneg %p883_p0  ;;  %p890_p2 = por %p889_p1, %p888_p9 }
 0x1c8   : > { %665 = vst.msk [vmem:[%s1218_s9 + $0xc] sm:$0xf] %vm365_vm2, %v409_v20  ;;  %664 = vst.msk [vmem:[%s1270_s28 + $0x8] sm:$0xf] %vm365_vm2, %v404_v21 }
 0x1c9   : > { %p891_p7 = pnand %p890_p2, %p884_p5 }
 0x1cb   : > { %894 = shalt.err (!%p891_p7)
}
 0x1cc   : > { %s895_s9 = scalar_lea.hbm %s1285_s17, 256  ;;  %s899_s16 = scalar_lea.hbm %s1384_s3, 512 }
 0x1cd   : > { %p896_p3 = scmp.ne.s32.totalorder %s1285_s17, %s895_s9  ;;  %p900_p6 = scmp.lt.u32.totalorder %s1285_s17, %s1384_s3 }
 0x1ce   : > { %p901_p8 = scmp.lt.u32.totalorder %s899_s16, %s895_s9  ;;  %p903_p11 = scmp.lt.u32.totalorder %s895_s9, %s1285_s17 }
 0x1cf   : > { %p897_p4 = pnand %p896_p3, %p1146_p10 }
 0x1d0   : > { %p902_p12 = por %p901_p8, %p900_p6 }
 0x1d1   : > { %p898_p13 = pneg %p897_p4 }
 0x1d2   : > { %p904_p0 = por %p903_p11, %p902_p12 }
 0x1d4   : > { %p905_p5 = pnand %p904_p0, %p898_p13 }
 0x1d6   : > { %908 = shalt.err (!%p905_p5)
}
 0x1d7   : > { %s1403_s15 = scalar_lea.sflag [#allocation4], %s1199_s25  ;;  %s1404_s30 = sshll.u32 %s1270_s28, 4  ;;  %v419_v22 = vpop.permute.xlu0 %418  ;;  %s1321_s30 = int_to_ptr.vmem [resolvable:$true] %s1404_s30 }
 0x1d8   : > { %700 = dma.vmem_to_hbm [thread:$0]  (%p1146_p10), %s1279_s8, 256, %s1285_s17, %s1403_s15, %s1012_s14, %s1012_s14, %s1019_s24  }
 0x1d9   : > { %s1327_s9 = scalar_lea.hbm %s1386_s5, %s1226_s29  ;;  %667 = vst.msk [vmem:[%s1270_s28 + $0xc] sm:$0xf] %vm365_vm2, %v419_v22  ;;  %s909_s25 = scalar_lea.vmem %s1321_s30, 256 }
 0x1da   : > { %p910_p9 = scmp.ne.s32.totalorder %s1321_s30, %s909_s25  ;;  %s1021_s8 = smov [#allocation10]  }
 0x1db   : > { %s913_s17 = sshll.u32 %s1021_s8, 4  ;;  %s914_s17 = int_to_ptr.vmem [resolvable:$false] %s913_s17 }
 0x1dc   : > { %p911_p1 = pnand %p910_p9, %p1146_p10  ;;  %s915_s10 = scalar_lea.vmem %s914_s17, 512 }
 0x1dd   : > { %p916_p7 = scmp.lt.s32.totalorder %s1321_s30, %s914_s17  ;;  %p917_p3 = scmp.lt.s32.totalorder %s915_s10, %s909_s25 }
 0x1de   : > { %p912_p2 = pneg %p911_p1 }
 0x1df   : > { %p918_p4 = por %p917_p3, %p916_p7 }
 0x1e1   : > { %p919_p13 = pnand %p918_p4, %p912_p2 }
 0x1e3   : > { %922 = shalt.err (!%p919_p13)
}
 0x1e4   : > { %s923_s29 = scalar_lea.hbm %s1327_s9, 256  ;;  %s927_s26 = scalar_lea.hbm %s1386_s5, 512 }
 0x1e5   : > { %p924_p6 = scmp.ne.s32.totalorder %s1327_s9, %s923_s29  ;;  %p928_p11 = scmp.lt.u32.totalorder %s1327_s9, %s1386_s5 }
 0x1e6   : > { %p929_p0 = scmp.lt.u32.totalorder %s927_s26, %s923_s29  ;;  %p931_p9 = scmp.lt.u32.totalorder %s923_s29, %s1327_s9 }
 0x1e7   : > { %p925_p8 = pnand %p924_p6, %p1146_p10 }
 0x1e8   : > { %p930_p5 = por %p929_p0, %p928_p11 }
 0x1e9   : > { %p926_p12 = pneg %p925_p8 }
 0x1ea   : > { %p932_p1 = por %p931_p9, %p930_p5 }
 0x1ec   : > { %p933_p2 = pnand %p932_p1, %p926_p12 }
 0x1ee   : > { %936 = shalt.err (!%p933_p2)
}
 0x1ef   : > { %702 = dma.vmem_to_hbm [thread:$0]  (%p1146_p10), %s1321_s30, 256, %s1327_s9, %s1240_s21, %s1012_s14, %s1012_s14, %s1019_s24  }
 0x1f0 PF: > { %s497_s6 = sand.u32 1, %s979_s18   ;;  %p1405_p7 = scmp.ne.s32.totalorder %s1392_s27, 0 }
 0x1f1   : > { %p1406_p3 = scmp.ge.s32.totalorder %s999_s23, 2  ;;  %s498_s25 = scalar_lea.sflag [#allocation4], %s497_s6 }
 0x1f3   : > { %p715_p4 = pnand %p1406_p3, %p1405_p7 }
 0x1f5   : > { %970 = dma.done.wait (!%p715_p4), %s498_s25, 256  }
 0x1f6   : > { %972 = vsyncadd (!%p715_p4), %s498_s25, 4294967040  ;;  %s1407_s11 = sadd.s32 4294967294, %s999_s23  }
 0x1f7   : > { %s506_s8 = sand.u32 1, %s1407_s11  }
 0x1f8   : > { %s507_s17 = scalar_lea.sflag [#allocation9], %s506_s8 }
 0x1f9   : > { %974 = dma.done.wait (!%p715_p4), %s507_s17, 512  }
 0x1fa   : > { %976 = vsyncadd (!%p715_p4), %s507_s17, 4294966784  ;;  %s26_s23 = sadd.s32 1, %s999_s23   ;;  %s1408_s18 = smov %s983_s19 }
 0x1fb   : > { %p23_p10 = scmp.ge.s32.totalorder %s26_s23, 4   ;;  %s1409_s19 = smov %s987_s20 }
 0x1fc   : > { %s1410_s20 = smov %s1155_s13  ;;  %s1411_s21 = smov %s995_s22 }
 0x1fd   : > { %s1412_s22 = smov %s1414_s7  ;;  %25 = sbr.rel (!%p23_p10) target bundleno = 9 (0x9), region = 122 }
 0x204   :  { %521 = vsyncpa [#allocation3], 1 }
 0x205   :  { %523 = vsyncpa [#allocation3 + $0x1], 1 }
 0x206   :  { %524 = vsyncpa [#allocation6], 1 }
 0x207   :  { %525 = vsyncpa [#allocation4], 1 }
 0x208   :  { %527 = vsyncpa [#allocation4 + $0x1], 1 }
 0x209   :  { %528 = vsyncpa [#allocation9], 1 }
 0x20a   :  { %530 = vsyncpa [#allocation9 + $0x1], 1 }

// kernel: tpu_custom_call.1
= control target key start
LH: loop header
LB: loop body
LE: loop exit
PB: predicated region body
PF: predicated region fallthrough
CT: control target
= control target key end

     0   :  { %11 = vsyncpa [#allocation3], 0  ;;  %s1381_s0 = inlined_call_operand.hbm [shape: f32[2,8,32], index: 0, kind: input, shape index: {}]   ;;  %s1382_s1 = inlined_call_operand.hbm [shape: bf16[32,96], index: 1, kind: input, shape index: {}]   ;;  %s1383_s2 = inlined_call_operand.vmem [shape: f32[1,96], index: 2, kind: input, shape index: {}]   ;;  %s1384_s3 = inlined_call_operand.hbm [shape: bf16[2,4,8,8], index: 3, kind: output, shape index: {0}]   ;;  %s1385_s4 = inlined_call_operand.hbm [shape: bf16[2,4,8,8], index: 4, kind: output, shape index: {1}]   ;;  %s1386_s5 = inlined_call_operand.hbm [shape: bf16[2,4,8,8], index: 5, kind: output, shape index: {2}]  }
   0x1   :  { %13 = vsyncpa [#allocation3 + $0x1], 0 }
   0x2   :  { %14 = vsyncpa [#allocation6], 0 }
   0x3   :  { %15 = vsyncpa [#allocation4], 0 }
   0x4   :  { %17 = vsyncpa [#allocation4 + $0x1], 0 }
   0x5   :  { %18 = vsyncpa [#allocation9], 0 }
   0x6   :  { %20 = vsyncpa [#allocation9 + $0x1], 0  ;;  %s1052_s18 = smov 0   ;;  %s1054_s19 = smov 0  }
   0x7   :  { %s1056_s20 = smov 0   ;;  %s1058_s21 = smov 0  }
   0x8   :  { %s1060_s22 = smov 0   ;;  %s1062_s23 = smov 0  }
   0x9 LB: > { %s1083_s24 = sadd.s32 4294967295, %s999_s23   ;;  %s1390_s25 = sadd.s32 4294967294, %s999_s23   ;;  %s999_s23 = sphi %s1062_s23, %s26_s23   ;;  %s995_s22 = sphi %s1060_s22, %s1412_s22   ;;  %s991_s21 = sphi %s1058_s21, %s1411_s21   ;;  %s987_s20 = sphi %s1056_s20, %s1410_s20   ;;  %s983_s19 = sphi %s1054_s19, %s1409_s19   ;;  %s979_s18 = sphi %s1052_s18, %s1408_s18  }
   0xa   : > { %p60_p0 = scmp.ne.s32.totalorder %s983_s19, %s979_s18  ;;  %p1387_p1 = scmp.eq.s32.totalorder %s1083_s24, 0 }
   0xb   : > { %p134_p3 = scmp.eq.s32.totalorder %s1390_s25, 1  ;;  %p643_p5 = scmp.ge.s32.totalorder %s999_s23, 1 }
   0xc   : > { %p1094_p4 = por %p1387_p1, %p60_p0  ;;  %p197_p7 = scmp.lt.s32.totalorder %s999_s23, 3 }
   0xd   : > { %p1099_p6 = por %p134_p3, %p60_p0  ;;  %s1001_s29 = smov [#allocation5]  }
   0xe   : > { %s1391_s26 = scalar_select %p1094_p4, 1, 0 }
   0xf   : > { %s1392_s27 = scalar_select %p1099_p6, 1, 0 }
  0x10   : > { %p1104_p8 = pnand %p643_p5, %p197_p7  ;;  %s209_s30 = sshll.u32 %s1001_s29, 4  ;;  %s210_s30 = int_to_ptr.vmem [resolvable:$true] %s209_s30 }
  0x11   : > { %s38_s7 = sadd.s32 1, %s995_s22  ;;  %s795_s10 = scalar_lea.hbm %s1382_s1, 256 }
  0x12   : > { %s1393_s28 = scalar_select %p1104_p8, 1, 0 }
  0x13   : > { %p706_p9 = pneg %p1104_p8  ;;  %p796_p12 = scmp.ne.s32.totalorder %s1382_s1, %s795_s10 }
  0x14   : > { %p802_p5 = scmp.lt.u32.totalorder %s795_s10, %s1382_s1 }
  0x15   : > { %p1113_p11 = pnand %p706_p9, %p1387_p1 }
  0x17   : > { %p797_p13 = pneg %p1113_p11 }
  0x19   : > { %p798_p0 = pnand %p797_p13, %p796_p12 }
  0x1b   : > { %p799_p3 = pneg %p798_p0 }
  0x1d   : > { %p804_p7 = pnand %p802_p5, %p799_p3 }
  0x1f   : > { %807 = shalt.err (!%p804_p7)
}
  0x20   : > { %s808_s15 = scalar_lea.vmem %s210_s30, 256  ;;  %p816_p2 = scmp.lt.s32.totalorder %s210_s30, %s210_s30 }
  0x21   : > { %p809_p9 = scmp.ne.s32.totalorder %s210_s30, %s808_s15  ;;  %p817_p6 = scmp.lt.s32.totalorder %s808_s15, %s808_s15 }
  0x23   : > { %p811_p10 = pnand %p809_p9, %p797_p13  ;;  %p818_p4 = por %p817_p6, %p816_p2 }
  0x25   : > { %p812_p1 = pneg %p811_p10 }
  0x27   : > { %p819_p8 = pnand %p818_p4, %p812_p1 }
  0x29   : > { %822 = shalt.err (!%p819_p8)
}
  0x2a   : > { %s1002_s16 = smov 64   ;;  %s1003_s17 = smov 4  }
  0x2b   : > { %709 = dma.hbm_to_vmem [thread:$0]  (!%p1113_p11), %s1382_s1, 256, %s210_s30, [#allocation6], %s1002_s16, %s1002_s16, %s1003_s17  }
  0x2c   : > { %p40_p1 = scmp.ge.s32.totalorder %s38_s7, 2  ;;  %s47_s9 = sadd.s32 1, %s987_s20 }
  0x2d   : > { %p54_p2 = scmp.ne.s32.totalorder %s987_s20, %s983_s19  ;;  %p55_p4 = scmp.eq.s32.totalorder %s999_s23, 0 }
  0x2e   : > { %s1414_s7 = smov (%p40_p1, %s38_s7), 0  ;;  %p1396_p8 = scmp.eq.s32.totalorder %s1083_s24, 1 }
  0x2f   : > { %p1140_p6 = por %p55_p4, %p54_p2  ;;  %s42_s6 = ssub.s32 %s995_s22, %s1414_s7 }
  0x30   : > { %p1146_p10 = por %p1396_p8, %p54_p2  ;;  %p725_p12 = scmp.lt.s32.totalorder %s999_s23, 2 }
  0x31   : > { %p45_p11 = scmp.eq.s32.totalorder %s42_s6, 0  ;;  %s226_s30 = sand.u32 1, %s987_s20  }
  0x32   : > { %s646_s12 = sshll.u32 %s226_s30, 3  ;;  %s647_s14 = sshll.u32 %s995_s22, 7 }
  0x33   : > { %s1155_s13 = scalar_select %p45_p11, %s987_s20, %s47_s9  }
  0x34   : > { %s1161_s17 = scalar_lea.hbm %s1381_s0, %s647_s14  ;;  %s230_s29 = scalar_lea.vmem [#allocation2], %s646_s12 }
  0x35   : > { %s238_s8 = sshll.u32 %s230_s29, 4  ;;  %p1167_p13 = pnand %p725_p12, %p1140_p6  ;;  %s1163_s8 = int_to_ptr.vmem [resolvable:$true] %s238_s8 }
  0x36   : > { %s227_s9 = scalar_lea.sflag [#allocation3], %s226_s30  ;;  %s823_s25 = scalar_lea.hbm %s1161_s17, 128 }
  0x37   : > { %p824_p0 = scmp.ne.s32.totalorder %s1161_s17, %s823_s25  ;;  %p825_p3 = pneg %p1167_p13 }
  0x38   : > { %s828_s15 = scalar_lea.hbm %s1381_s0, 256  ;;  %p829_p9 = scmp.lt.u32.totalorder %s1161_s17, %s1381_s0 }
  0x39   : > { %p826_p5 = pnand %p825_p3, %p824_p0  ;;  %p830_p1 = scmp.lt.u32.totalorder %s828_s15, %s823_s25 }
  0x3a   : > { %p832_p4 = scmp.lt.u32.totalorder %s823_s25, %s1161_s17 }
  0x3b   : > { %p827_p7 = pneg %p826_p5  ;;  %p831_p2 = por %p830_p1, %p829_p9 }
  0x3d   : > { %p833_p6 = por %p832_p4, %p831_p2 }
  0x3f   : > { %p834_p8 = pnand %p833_p6, %p827_p7 }
  0x41   : > { %837 = shalt.err (!%p834_p8)
}
  0x42   : > { %s838_s30 = scalar_lea.vmem %s1163_s8, 128  ;;  %s1004_s29 = smov [#allocation2]  }
  0x43   : > { %p839_p12 = scmp.ne.s32.totalorder %s1163_s8, %s838_s30  ;;  %s843_s12 = sshll.u32 %s1004_s29, 4  ;;  %s844_s12 = int_to_ptr.vmem [resolvable:$false] %s843_s12 }
  0x44   : > { %s845_s14 = scalar_lea.vmem %s844_s12, 256  ;;  %p846_p5 = scmp.lt.s32.totalorder %s1163_s8, %s844_s12 }
  0x45   : > { %p841_p11 = pnand %p839_p12, %p825_p3  ;;  %p847_p9 = scmp.lt.s32.totalorder %s845_s14, %s838_s30 }
  0x47   : > { %p842_p0 = pneg %p841_p11  ;;  %p848_p1 = por %p847_p9, %p846_p5 }
  0x49   : > { %p849_p2 = pnand %p848_p1, %p842_p0 }
  0x4b   : > { %852 = shalt.err (!%p849_p2)
}
  0x4c   : > { %713 = dma.hbm_to_vmem [thread:$0]  (!%p1167_p13), %s1161_s17, 128, %s1163_s8, %s227_s9  }
  0x4d   : > { %p1399_p7 = scmp.ne.s32.totalorder %s1393_s28, 0 }
  0x4e   : > { %s1199_s25 = sand.u32 (!%p1399_p7), 1, %s983_s19   ;;  %p1400_p3 = scmp.ne.s32.totalorder (!%p1399_p7), %s1391_s26, 0 }
  0x4f   : > { %247 = sbr.rel (%p1399_p7) target bundleno = 496 (0x1f0), region = 32  ;;  %s649_s15 = sshll.u32 (!%p1399_p7), %s1199_s25, 3 }
  0x50   : > { %s250_s10 = scalar_lea.sflag (!%p1399_p7), [#allocation3], %s1199_s25  ;;  %s253_s16 = scalar_lea.vmem (!%p1399_p7), [#allocation2], %s649_s15 }
  0x56   : > { %962 = dma.done.wait (%p1400_p3), %s250_s10, 128  }
  0x57   : > { %964 = vsyncadd (%p1400_p3), %s250_s10, 4294967168  ;;  %p1401_p4 = scmp.eq.s32.totalorder %s1083_s24, 0 }
  0x59   : > { %966 = dma.done.wait (%p1401_p4), [#allocation6], 256   ;;  %p1402_p13 = pmov %p1401_p4 }
  0x5a   : > { %v1005_v0 = vmov 0.0   ;;  %vm1006_vm0 = vmmov 0   ;;  %v793_v1 = vld [vmem:[#allocation5] sm:$0xff]   ;;  %v794_v2 = vld [vmem:[#allocation5 + $0x8] sm:$0xff]   ;;  %v295_v3 = vld [vmem:[%s253_s16] sm:$0xff]  ;;  %vm320_vm1 = vcmask 261120  }
  0x5b   : > { %968 = vsyncadd (%p1402_p13), [#allocation6], 4294967040  ;;  %686 = vmatprep.subr.bf16.mxu0 %v1005_v0  ;;  %690 = vmatprep.mubr.msk.bf16.mxu0 %vm1006_vm0, %v1005_v0  ;;  %v300_v4 = vpack.c.bf16 %v295_v3, %v295_v3  ;;  %v654_v5 = vld [vmem:[%s1383_s2] ss:$0 sm:$0xff]  ;;  %s1215_s17 = sshll.u32 %s1199_s25, 4  ;;  %vm365_vm2 = vcmask 60416  }
  0x5c   : > { %687 = vmatpush3.bf16.msra.mxu0 %v793_v1  ;;  %s1007_s8 = smov 80   ;;  %s1008_s6 = smov 96  }
  0x5d   : > { %688 = vmatprep.subr.bf16.mxu0 %v1005_v0  ;;  %s1218_s9 = scalar_lea.vmem [#allocation7], %s1215_s17  ;;  %s1009_s30 = smov 72  }
  0x5e   : > { %s1010_s29 = smov 88   ;;  %s1011_s12 = smov 120  }
  0x5f   : > { %s1012_s14 = smov 64   ;;  %s1013_s15 = smov 112  }
  0x60   : > { %689 = vmatpush3.bf16.msra.mxu0 %v794_v2  ;;  %s1014_s10 = smov 56   ;;  %s1015_s16 = smov 104  }
  0x61   : > { %s1016_s26 = smov 48   ;;  %s1017_s28 = smov 40  }
  0x63   : > { %691 = vmatmul.mubr.msk.bf16.vlgmr.msra.gmra.mrb[0].mxu0 %vm320_vm1, %v300_v4 }
 0x136   : > { %v358_v6 = vpop.f32.mrb[0].mxu0 }
 0x137   : > { %v359_v7 = vadd.f32 %v654_v5, %v358_v6  ;;  %v692_v8 = vpop.f32.mrb[1].mxu0 }
 0x138   : > { %v361_v9 = vpop.f32.mrb[2].mxu0 }
 0x139   : > { %v364_v10 = vpack.c.bf16 %v359_v7, %v359_v7  ;;  %v693_v11 = vpop.f32.mrb[3].mxu0 }
 0x13b   : > { %398 = vrot.lane.b32.xlu1 %v364_v10, %s1007_s8  ;;  %370 = vrot.lane.b32.xlu0 %v364_v10, %s1008_s6  ;;  %366 = vst.msk [vmem:[%s1218_s9] sm:$0xf] %vm365_vm2, %v364_v10  ;;  %s286_s8 = scalar_lea.vmem [#allocation8], %s1215_s17 }
 0x13c   : > { %s465_s6 = sshll.u32 %s286_s8, 4  ;;  %s1230_s6 = int_to_ptr.vmem [resolvable:$true] %s465_s6 }
 0x13f   : > { %413 = vrot.lane.b32.xlu1 %v364_v10, %s1009_s30  ;;  %383 = vrot.lane.b32.xlu0 %v364_v10, %s1010_s29  ;;  %s428_s30 = sand.u32 1, %s1083_s24   ;;  %s1226_s29 = sshll.u32 %s991_s21, 8 }
 0x140   : > { %s1240_s21 = scalar_lea.sflag [#allocation9], %s428_s30  ;;  %s853_s24 = scalar_lea.vmem %s1230_s6, 256 }
 0x141   : > { %p854_p6 = scmp.ne.s32.totalorder %s1230_s6, %s853_s24 }
 0x143   : > { %378 = vrot.lane.b32.xlu1 %v364_v10, %s1011_s12  ;;  %374 = vrot.lane.b32.xlu0 %v364_v10, %s1012_s14  ;;  %p855_p8 = pnand %p854_p6, %p1146_p10 }
 0x145   : > { %p856_p12 = pneg %p855_p8 }
 0x147   : > { %393 = vrot.lane.b32.xlu1 %v364_v10, %s1013_s15  ;;  %388 = vrot.lane.b32.xlu0 %v364_v10, %s1014_s10  ;;  %s1236_s10 = scalar_lea.hbm %s1385_s4, %s1226_s29 }
 0x14b   : > { %408 = vrot.lane.b32.xlu1 %v364_v10, %s1015_s16  ;;  %403 = vrot.lane.b32.xlu0 %v364_v10, %s1016_s26  ;;  %s1018_s16 = smov [#allocation8]  }
 0x14c   : > { %s857_s26 = sshll.u32 %s1018_s16, 4  ;;  %s858_s26 = int_to_ptr.vmem [resolvable:$false] %s857_s26 }
 0x14d   : > { %p860_p11 = scmp.lt.s32.totalorder %s1230_s6, %s858_s26 }
 0x14f   : > { %418 = vrot.lane.b32.xlu0 %v364_v10, %s1017_s28  ;;  %s859_s28 = scalar_lea.vmem %s858_s26, 512 }
 0x150   : > { %p861_p0 = scmp.lt.s32.totalorder %s859_s28, %s853_s24 }
 0x152   : > { %p862_p5 = por %p861_p0, %p860_p11 }
 0x154   : > { %p863_p9 = pnand %p862_p5, %p856_p12 }
 0x1ad   : > { %v399_v12 = vpop.permute.xlu1 %398  ;;  %v371_v13 = vpop.permute.xlu0 %370 }
 0x1ae   : > { %663 = vst.msk [vmem:[%s286_s8 + $0x8] sm:$0xf] %vm365_vm2, %v399_v12  ;;  %373 = vst.msk [vmem:[%s286_s8] sm:$0xf] %vm365_vm2, %v371_v13 }
 0x1b1   : > { %v414_v14 = vpop.permute.xlu1 %413  ;;  %v384_v15 = vpop.permute.xlu0 %383 }
 0x1b2   : > { %666 = vst.msk [vmem:[%s286_s8 + $0xc] sm:$0xf] %vm365_vm2, %v414_v14  ;;  %660 = vst.msk [vmem:[%s286_s8 + $0x4] sm:$0xf] %vm365_vm2, %v384_v15 }
 0x1b3   : > { %866 = shalt.err (!%p863_p9)
}
 0x1b4   : > { %s867_s8 = scalar_lea.hbm %s1236_s10, 256  ;;  %s871_s15 = scalar_lea.hbm %s1385_s4, 512 }
 0x1b5   : > { %p868_p1 = scmp.ne.s32.totalorder %s1236_s10, %s867_s8  ;;  %p872_p3 = scmp.lt.u32.totalorder %s1236_s10, %s1385_s4 }
 0x1b6   : > { %p873_p4 = scmp.lt.u32.totalorder %s871_s15, %s867_s8  ;;  %p875_p6 = scmp.lt.u32.totalorder %s867_s8, %s1236_s10 }
 0x1b7   : > { %p869_p2 = pnand %p868_p1, %p1146_p10 }
 0x1b8   : > { %p874_p13 = por %p873_p4, %p872_p3 }
 0x1b9   : > { %p870_p7 = pneg %p869_p2 }
 0x1ba   : > { %p876_p8 = por %p875_p6, %p874_p13 }
 0x1bc   : > { %p877_p12 = pnand %p876_p8, %p870_p7 }
 0x1be   : > { %880 = shalt.err (!%p877_p12)
}
 0x1bf   : > { %s1019_s24 = smov 4   ;;  %v379_v16 = vpop.permute.xlu1 %378  ;;  %v375_v17 = vpop.permute.xlu0 %374  ;;  %s1270_s28 = scalar_lea.vmem [#allocation10], %s1215_s17 }
 0x1c0   : > { %701 = dma.vmem_to_hbm [thread:$0]  (%p1146_p10), %s1230_s6, 256, %s1236_s10, %s1240_s21, %s1012_s14, %s1012_s14, %s1019_s24  }
 0x1c1   : > { %659 = vst.msk [vmem:[%s1218_s9 + $0x4] sm:$0xf] %vm365_vm2, %v379_v16  ;;  %377 = vst.msk [vmem:[%s1270_s28] sm:$0xf] %vm365_vm2, %v375_v17  ;;  %s448_s8 = sshll.u32 %s1218_s9, 4  ;;  %s1285_s17 = scalar_lea.hbm %s1384_s3, %s1226_s29  ;;  %s1279_s8 = int_to_ptr.vmem [resolvable:$true] %s448_s8 }
 0x1c2   : > { %s881_s15 = scalar_lea.vmem %s1279_s8, 256  ;;  %s1020_s16 = smov [#allocation7]  }
 0x1c3   : > { %v394_v18 = vpop.permute.xlu1 %393  ;;  %v389_v19 = vpop.permute.xlu0 %388  ;;  %p882_p11 = scmp.ne.s32.totalorder %s1279_s8, %s881_s15  ;;  %s885_s26 = sshll.u32 %s1020_s16, 4  ;;  %s886_s26 = int_to_ptr.vmem [resolvable:$false] %s885_s26 }
 0x1c4   : > { %662 = vst.msk [vmem:[%s1218_s9 + $0x8] sm:$0xf] %vm365_vm2, %v394_v18  ;;  %661 = vst.msk [vmem:[%s1270_s28 + $0x4] sm:$0xf] %vm365_vm2, %v389_v19  ;;  %s887_s6 = scalar_lea.vmem %s886_s26, 512  ;;  %p888_p9 = scmp.lt.s32.totalorder %s1279_s8, %s886_s26 }
 0x1c5   : > { %p883_p0 = pnand %p882_p11, %p1146_p10  ;;  %p889_p1 = scmp.lt.s32.totalorder %s887_s6, %s881_s15 }
 0x1c7   : > { %v409_v20 = vpop.permute.xlu1 %408  ;;  %v404_v21 = vpop.permute.xlu0 %403  ;;  %p884_p5 = pneg %p883_p0  ;;  %p890_p2 = por %p889_p1, %p888_p9 }
 0x1c8   : > { %665 = vst.msk [vmem:[%s1218_s9 + $0xc] sm:$0xf] %vm365_vm2, %v409_v20  ;;  %664 = vst.msk [vmem:[%s1270_s28 + $0x8] sm:$0xf] %vm365_vm2, %v404_v21 }
 0x1c9   : > { %p891_p7 = pnand %p890_p2, %p884_p5 }
 0x1cb   : > { %894 = shalt.err (!%p891_p7)
}
 0x1cc   : > { %s895_s9 = scalar_lea.hbm %s1285_s17, 256  ;;  %s899_s16 = scalar_lea.hbm %s1384_s3, 512 }
 0x1cd   : > { %p896_p3 = scmp.ne.s32.totalorder %s1285_s17, %s895_s9  ;;  %p900_p6 = scmp.lt.u32.totalorder %s1285_s17, %s1384_s3 }
 0x1ce   : > { %p901_p8 = scmp.lt.u32.totalorder %s899_s16, %s895_s9  ;;  %p903_p11 = scmp.lt.u32.totalorder %s895_s9, %s1285_s17 }
 0x1cf   : > { %p897_p4 = pnand %p896_p3, %p1146_p10 }
 0x1d0   : > { %p902_p12 = por %p901_p8, %p900_p6 }
 0x1d1   : > { %p898_p13 = pneg %p897_p4 }
 0x1d2   : > { %p904_p0 = por %p903_p11, %p902_p12 }
 0x1d4   : > { %p905_p5 = pnand %p904_p0, %p898_p13 }
 0x1d6   : > { %908 = shalt.err (!%p905_p5)
}
 0x1d7   : > { %s1403_s15 = scalar_lea.sflag [#allocation4], %s1199_s25  ;;  %s1404_s30 = sshll.u32 %s1270_s28, 4  ;;  %v419_v22 = vpop.permute.xlu0 %418  ;;  %s1321_s30 = int_to_ptr.vmem [resolvable:$true] %s1404_s30 }
 0x1d8   : > { %700 = dma.vmem_to_hbm [thread:$0]  (%p1146_p10), %s1279_s8, 256, %s1285_s17, %s1403_s15, %s1012_s14, %s1012_s14, %s1019_s24  }
 0x1d9   : > { %s1327_s9 = scalar_lea.hbm %s1386_s5, %s1226_s29  ;;  %667 = vst.msk [vmem:[%s1270_s28 + $0xc] sm:$0xf] %vm365_vm2, %v419_v22  ;;  %s909_s25 = scalar_lea.vmem %s1321_s30, 256 }
 0x1da   : > { %p910_p9 = scmp.ne.s32.totalorder %s1321_s30, %s909_s25  ;;  %s1021_s8 = smov [#allocation10]  }
 0x1db   : > { %s913_s17 = sshll.u32 %s1021_s8, 4  ;;  %s914_s17 = int_to_ptr.vmem [resolvable:$false] %s913_s17 }
 0x1dc   : > { %p911_p1 = pnand %p910_p9, %p1146_p10  ;;  %s915_s10 = scalar_lea.vmem %s914_s17, 512 }
 0x1dd   : > { %p916_p7 = scmp.lt.s32.totalorder %s1321_s30, %s914_s17  ;;  %p917_p3 = scmp.lt.s32.totalorder %s915_s10, %s909_s25 }
 0x1de   : > { %p912_p2 = pneg %p911_p1 }
 0x1df   : > { %p918_p4 = por %p917_p3, %p916_p7 }
 0x1e1   : > { %p919_p13 = pnand %p918_p4, %p912_p2 }
 0x1e3   : > { %922 = shalt.err (!%p919_p13)
}
 0x1e4   : > { %s923_s29 = scalar_lea.hbm %s1327_s9, 256  ;;  %s927_s26 = scalar_lea.hbm %s1386_s5, 512 }
 0x1e5   : > { %p924_p6 = scmp.ne.s32.totalorder %s1327_s9, %s923_s29  ;;  %p928_p11 = scmp.lt.u32.totalorder %s1327_s9, %s1386_s5 }
 0x1e6   : > { %p929_p0 = scmp.lt.u32.totalorder %s927_s26, %s923_s29  ;;  %p931_p9 = scmp.lt.u32.totalorder %s923_s29, %s1327_s9 }
 0x1e7   : > { %p925_p8 = pnand %p924_p6, %p1146_p10 }
 0x1e8   : > { %p930_p5 = por %p929_p0, %p928_p11 }
 0x1e9   : > { %p926_p12 = pneg %p925_p8 }
 0x1ea   : > { %p932_p1 = por %p931_p9, %p930_p5 }
 0x1ec   : > { %p933_p2 = pnand %p932_p1, %p926_p12 }
 0x1ee   : > { %936 = shalt.err (!%p933_p2)
}
 0x1ef   : > { %702 = dma.vmem_to_hbm [thread:$0]  (%p1146_p10), %s1321_s30, 256, %s1327_s9, %s1240_s21, %s1012_s14, %s1012_s14, %s1019_s24  }
 0x1f0 PF: > { %s497_s6 = sand.u32 1, %s979_s18   ;;  %p1405_p7 = scmp.ne.s32.totalorder %s1392_s27, 0 }
 0x1f1   : > { %p1406_p3 = scmp.ge.s32.totalorder %s999_s23, 2  ;;  %s498_s25 = scalar_lea.sflag [#allocation4], %s497_s6 }
 0x1f3   : > { %p715_p4 = pnand %p1406_p3, %p1405_p7 }
 0x1f5   : > { %970 = dma.done.wait (!%p715_p4), %s498_s25, 256  }
 0x1f6   : > { %972 = vsyncadd (!%p715_p4), %s498_s25, 4294967040  ;;  %s1407_s11 = sadd.s32 4294967294, %s999_s23  }
 0x1f7   : > { %s506_s8 = sand.u32 1, %s1407_s11  }
 0x1f8   : > { %s507_s17 = scalar_lea.sflag [#allocation9], %s506_s8 }
 0x1f9   : > { %974 = dma.done.wait (!%p715_p4), %s507_s17, 512  }
 0x1fa   : > { %976 = vsyncadd (!%p715_p4), %s507_s17, 4294966784  ;;  %s26_s23 = sadd.s32 1, %s999_s23   ;;  %s1408_s18 = smov %s983_s19 }
 0x1fb   : > { %p23_p10 = scmp.ge.s32.totalorder %s26_s23, 4   ;;  %s1409_s19 = smov %s987_s20 }
 0x1fc   : > { %s1410_s20 = smov %s1155_s13  ;;  %s1411_s21 = smov %s995_s22 }
 0x1fd   : > { %s1412_s22 = smov %s1414_s7  ;;  %25 = sbr.rel (!%p23_p10) target bundleno = 9 (0x9), region = 122 }
 0x204   :  { %521 = vsyncpa [#allocation3], 1 }
 0x205   :  { %523 = vsyncpa [#allocation3 + $0x1], 1 }
 0x206   :  { %524 = vsyncpa [#allocation6], 1 }
 0x207   :  { %525 = vsyncpa [#allocation4], 1 }
 0x208   :  { %527 = vsyncpa [#allocation4 + $0x1], 1 }
 0x209   :  { %528 = vsyncpa [#allocation9], 1 }
 0x20a   :  { %530 = vsyncpa [#allocation9 + $0x1], 1 }

</bundles_post_ra>
